<compile_context>
chip_gen: v7x
topology: tpu7x:2x2x1
jax: 0.10.0
libtpu: 0.0.40
codegen_flags: <defaults>
</compile_context>

<pallas_src>
import functools

import jax
import jax.numpy as jnp
import numpy as np
from jax.experimental import pallas as pl
from jax.experimental.pallas import tpu as pltpu


def _round_up(v, m):
    return (v + m - 1) // m * m


def _node_processor_kernel(eblk_ref, klo_ref, khi_ref,          # scalar prefetch (SMEM)
                           j_ref, x_ref, e_ref,                 # tiled inputs
                           w1x_ref, w1e_ref, b1_ref,
                           w2_ref, b2_ref, gamma_ref, beta_ref,  # resident params
                           out_ref,                              # tiled output
                           agg_ref,                              # VMEM scratch (TN, De_pad)
                           *, dn_real, mxu_dtype):
    i = pl.program_id(0)                       # node-tile index ("parallel")
    k = pl.program_id(1)                       # edge-block step ("arbitrary" reduction)
    tn = agg_ref.shape[0]
    te = e_ref.shape[0]

    @pl.when(k == 0)
    def _():
        agg_ref[...] = jnp.zeros_like(agg_ref)

    # Scatter-sum for this node tile.  Only steps inside [klo, khi) hold edge
    # blocks of this tile's (sorted) edge segment; other steps are skipped.
    @pl.when(jnp.logical_and(k >= klo_ref[i], k < khi_ref[i]))
    def _():
        node_ids = i * tn + jax.lax.broadcasted_iota(jnp.int32, (tn, te), 0)
        onehot = (node_ids == j_ref[...]).astype(mxu_dtype)       # (TN, TE)
        agg_ref[...] += jnp.dot(onehot, e_ref[...].astype(mxu_dtype),
                                preferred_element_type=jnp.float32)

    @pl.when(k == pl.num_programs(1) - 1)
    def _():
        x = x_ref[...].astype(jnp.float32)                        # (TN, Dn_pad)
        agg = agg_ref[...]                                        # (TN, De_pad) f32
        # MLP layer 1: cat([x, agg]) @ W1 + b1, W1 split into x / agg halves.
        h = (jnp.dot(x.astype(mxu_dtype), w1x_ref[...],
                     preferred_element_type=jnp.float32)
             + jnp.dot(agg.astype(mxu_dtype), w1e_ref[...],
                       preferred_element_type=jnp.float32)
             + b1_ref[...])
        h = h * jax.nn.sigmoid(h)                                 # SiLU (f32 on VPU/EUP)
        # MLP layer 2 (no activation).
        y = (jnp.dot(h.astype(mxu_dtype), w2_ref[...],
                     preferred_element_type=jnp.float32) + b2_ref[...])
        # LayerNorm over the real Dn features only.  Padded columns of y are
        # exactly zero (padded weight columns / biases are zero), so only the
        # variance term needs an explicit lane mask.
        dpad = y.shape[-1]
        feat_mask = (jax.lax.broadcasted_iota(jnp.int32, (1, dpad), 1)
                     < dn_real).astype(jnp.float32)
        inv_d = 1.0 / dn_real
        mean = jnp.sum(y, axis=-1, keepdims=True) * inv_d
        diff = (y - mean) * feat_mask
        var = jnp.sum(diff * diff, axis=-1, keepdims=True) * inv_d
        ln = diff * jax.lax.rsqrt(var + 1e-5) * gamma_ref[...] + beta_ref[...]
        # Residual, lane-dense (Dn_pad = multiple of 128) store.
        out_ref[...] = (x + ln).astype(out_ref.dtype)


def node_processor(x, edge_index, edge_attr, params, *,
                   tile_n=128, tile_e=512, mxu_dtype=jnp.bfloat16):
    """x: (N, Dn) f32, edge_index: (2, E) i32, edge_attr: (E, De) f32."""
    N, Dn = x.shape
    E, De = edge_attr.shape
    w1, b1, w2, b2, gamma, beta = (params["w1"], params["b1"], params["w2"],
                                   params["b2"], params["gamma"], params["beta"])
    H = w1.shape[1]
    assert w1.shape[0] == Dn + De

    # ---- lane/sublane padding: 128-lane features, tile_n node rows ----------
    dn_p, de_p, h_p = _round_up(Dn, 128), _round_up(De, 128), _round_up(H, 128)
    n_p = _round_up(max(N, tile_n), tile_n)
    e_p = _round_up(max(E, tile_e), tile_e)
    n_tiles, num_eb = n_p // tile_n, e_p // tile_e

    # ---- CSR-style edge layout: sort edges by destination node --------------
    # TODO(synk): for a fully jittable path, do the sort/offsets in XLA with a
    # static per-tile block-count bound instead of host numpy (recompiles when
    # the max segment length changes).
    j_np = np.asarray(edge_index[1], dtype=np.int32)
    order = np.argsort(j_np, kind="stable")
    j_sorted = j_np[order]
    e_sorted = jnp.take(edge_attr, jnp.asarray(order), axis=0)

    sentinel = np.int32(n_p)                       # never matches any node id
    j_full = np.full((1, e_p), sentinel, np.int32)
    j_full[0, :E] = j_sorted

    # Per node tile: contiguous edge segment -> window of edge blocks.
    lo = np.searchsorted(j_sorted, np.arange(n_tiles) * tile_n, side="left")
    hi = np.searchsorted(j_sorted, (np.arange(n_tiles) + 1) * tile_n, side="left")
    bstart = lo // tile_e
    bend = (hi + tile_e - 1) // tile_e
    nb = np.where(hi > lo, bend - bstart, 0)
    kmax = int(max(1, nb.max()))                   # grid extent of the edge axis
    eblk = np.minimum(bstart, num_eb - kmax).astype(np.int32)   # keep walk in range
    klo = (bstart - eblk).astype(np.int32)
    khi = (klo + nb).astype(np.int32)

    # ---- zero-padded operands (weights feed the MXU in mxu_dtype) -----------
    f32 = jnp.float32
    x_p = jnp.zeros((n_p, dn_p), f32).at[:N, :Dn].set(x.astype(f32))
    e_full = jnp.zeros((e_p, de_p), f32).at[:E, :De].set(e_sorted.astype(f32))
    w1x = jnp.zeros((dn_p, h_p), f32).at[:Dn, :H].set(w1[:Dn]).astype(mxu_dtype)
    w1e = jnp.zeros((de_p, h_p), f32).at[:De, :H].set(w1[Dn:]).astype(mxu_dtype)
    w2_p = jnp.zeros((h_p, dn_p), f32).at[:H, :Dn].set(w2).astype(mxu_dtype)
    b1_p = jnp.zeros((1, h_p), f32).at[0, :H].set(b1)
    b2_p = jnp.zeros((1, dn_p), f32).at[0, :Dn].set(b2)
    gamma_p = jnp.zeros((1, dn_p), f32).at[0, :Dn].set(gamma)
    beta_p = jnp.zeros((1, dn_p), f32).at[0, :Dn].set(beta)

    # ---- BlockSpecs ----------------------------------------------------------
    def edge_map(i, k, eblk_ref, klo_ref, khi_ref):
        return (eblk_ref[i] + k, 0)

    def j_map(i, k, eblk_ref, klo_ref, khi_ref):
        return (0, eblk_ref[i] + k)

    def node_map(i, k, *_):
        return (i, 0)

    def const_map(i, k, *_):
        return (0, 0)

    grid_spec = pltpu.PrefetchScalarGridSpec(
        num_scalar_prefetch=3,
        grid=(n_tiles, kmax),
        in_specs=[
            pl.BlockSpec((1, tile_e), j_map),            # j (sorted, sentinel-padded)
            pl.BlockSpec((tile_n, dn_p), node_map),      # x
            pl.BlockSpec((tile_e, de_p), edge_map),      # edge_attr (sorted, padded)
            pl.BlockSpec((dn_p, h_p), const_map),        # W1 (x half)   - resident
            pl.BlockSpec((de_p, h_p), const_map),        # W1 (agg half) - resident
            pl.BlockSpec((1, h_p), const_map),           # b1
            pl.BlockSpec((h_p, dn_p), const_map),        # W2
            pl.BlockSpec((1, dn_p), const_map),          # b2
            pl.BlockSpec((1, dn_p), const_map),          # gamma
            pl.BlockSpec((1, dn_p), const_map),          # beta
        ],
        out_specs=pl.BlockSpec((tile_n, dn_p), node_map),
        scratch_shapes=[pltpu.VMEM((tile_n, de_p), jnp.float32)],
    )

    out_p = pl.pallas_call(
        functools.partial(_node_processor_kernel, dn_real=Dn, mxu_dtype=mxu_dtype),
        grid_spec=grid_spec,
        out_shape=jax.ShapeDtypeStruct((n_p, dn_p), x.dtype),
        compiler_params=pltpu.CompilerParams(
            dimension_semantics=("parallel", "arbitrary"),
            vmem_limit_bytes=48 * 1024 * 1024),
    )(jnp.asarray(eblk), jnp.asarray(klo), jnp.asarray(khi),
      jnp.asarray(j_full), x_p, e_full,
      w1x, w1e, b1_p, w2_p, b2_p, gamma_p, beta_p)

    return out_p[:N, :Dn]


def _reference(x, edge_index, edge_attr, params):
    """Plain-JAX reference mirroring the PyTorch forward (all f32)."""
    N = x.shape[0]
    j = edge_index[1]
    agg = jnp.zeros((N, edge_attr.shape[1]), x.dtype).at[j].add(edge_attr)
    h = jnp.concatenate([x, agg], axis=-1)
    h = h @ params["w1"] + params["b1"]
    h = jax.nn.silu(h)
    y = h @ params["w2"] + params["b2"]
    mean = jnp.mean(y, axis=-1, keepdims=True)
    var = jnp.mean((y - mean) ** 2, axis=-1, keepdims=True)
    y = (y - mean) / jnp.sqrt(var + 1e-5) * params["gamma"] + params["beta"]
    return x + y


if __name__ == "__main__":
    # Small GNN-sized problem: 300 nodes, 2000 edges, dims = [Dn + De, H, Dn].
    # Exercises multiple node tiles and multiple edge blocks.
    N, E, Dn, De, H = 300, 2000, 32, 32, 64

    key = jax.random.PRNGKey(0)
    k = jax.random.split(key, 8)
    x = jax.random.normal(k[0], (N, Dn), jnp.float32)
    edge_attr = jax.random.normal(k[1], (E, De), jnp.float32)
    edge_index = jax.random.randint(k[2], (2, E), 0, N, jnp.int32)

    params = {
        "w1": 0.05 * jax.random.normal(k[3], (Dn + De, H), jnp.float32),
        "b1": 0.01 * jax.random.normal(k[4], (H,), jnp.float32),
        "w2": 0.05 * jax.random.normal(k[5], (H, Dn), jnp.float32),
        "b2": 0.01 * jax.random.normal(k[6], (Dn,), jnp.float32),
        "gamma": jnp.ones((Dn,), jnp.float32),
        "beta": jnp.zeros((Dn,), jnp.float32),
    }

    ref = _reference(x, edge_index, edge_attr, params)

    # f32-MXU path: tight numerical match to the reference.
    out_f32 = jax.block_until_ready(
        node_processor(x, edge_index, edge_attr, params, mxu_dtype=jnp.float32))
    assert out_f32.shape == (N, Dn)
    err_f32 = float(jnp.max(jnp.abs(out_f32 - ref)))
    assert jnp.allclose(out_f32, ref, atol=2e-4, rtol=2e-4), err_f32

    # bf16-MXU path (the perf mode for v6e/v7x): loose check, f32 accumulation
    # keeps the error small (typical relative L2 ~3%).
    out_bf16 = jax.block_until_ready(
        node_processor(x, edge_index, edge_attr, params, mxu_dtype=jnp.bfloat16))
    rel = float(jnp.linalg.norm(out_bf16 - ref) / jnp.linalg.norm(ref))
    assert rel < 0.1, rel

    print("KERNEL_OK")
</pallas_src>

<mosaic_0001>
module attributes {stable_mosaic.version = 11 : i64} {
  func.func @_node_processor_kernel(%arg0: i32, %arg1: i32, %arg2: memref<3xi32, #tpu.memory_space<smem>>, %arg3: memref<3xi32, #tpu.memory_space<smem>>, %arg4: memref<3xi32, #tpu.memory_space<smem>>, %arg5: memref<1x512xi32, #tpu.memory_space<vmem>>, %arg6: memref<128x128xf32, #tpu.memory_space<vmem>>, %arg7: memref<512x128xf32, #tpu.memory_space<vmem>>, %arg8: memref<128x128xf32, #tpu.memory_space<vmem>>, %arg9: memref<128x128xf32, #tpu.memory_space<vmem>>, %arg10: memref<1x128xf32, #tpu.memory_space<vmem>>, %arg11: memref<128x128xf32, #tpu.memory_space<vmem>>, %arg12: memref<1x128xf32, #tpu.memory_space<vmem>>, %arg13: memref<1x128xf32, #tpu.memory_space<vmem>>, %arg14: memref<1x128xf32, #tpu.memory_space<vmem>>, %arg15: memref<128x128xf32, #tpu.memory_space<vmem>>, %arg16: memref<128x128xf32, #tpu.memory_space<vmem>>) attributes {dimension_semantics = [#tpu.dimension_semantics<parallel>, #tpu.dimension_semantics<arbitrary>], iteration_bounds = array<i64: 3, 3>, scalar_prefetch = 3 : i64, scratch_operands = 1 : i64, tpu.core_type = #tpu.core_type<tc>, window_params = [{transform_indices = @transform_0, window_bounds = array<i64: 1, 512>}, {transform_indices = @transform_1, window_bounds = array<i64: 128, 128>}, {transform_indices = @transform_2, window_bounds = array<i64: 512, 128>}, {pipeline_mode = #tpu.pipeline_mode<synchronous>, transform_indices = @transform_3, window_bounds = array<i64: 128, 128>}, {pipeline_mode = #tpu.pipeline_mode<synchronous>, transform_indices = @transform_4, window_bounds = array<i64: 128, 128>}, {pipeline_mode = #tpu.pipeline_mode<synchronous>, transform_indices = @transform_5, window_bounds = array<i64: 1, 128>}, {pipeline_mode = #tpu.pipeline_mode<synchronous>, transform_indices = @transform_6, window_bounds = array<i64: 128, 128>}, {pipeline_mode = #tpu.pipeline_mode<synchronous>, transform_indices = @transform_7, window_bounds = array<i64: 1, 128>}, {pipeline_mode = #tpu.pipeline_mode<synchronous>, transform_indices = @transform_8, window_bounds = array<i64: 1, 128>}, {pipeline_mode = #tpu.pipeline_mode<synchronous>, transform_indices = @transform_9, window_bounds = array<i64: 1, 128>}, {transform_indices = @transform_10, window_bounds = array<i64: 128, 128>}]} {
    %c0_i32 = arith.constant 0 : i32
    %0 = arith.cmpi eq, %arg1, %c0_i32 : i32
    %1 = arith.extui %0 : i1 to i32
    %c0_i32_0 = arith.constant 0 : i32
    %2 = arith.cmpi ne, %1, %c0_i32_0 : i32
    scf.if %2 {
      %cst = arith.constant 0.000000e+00 : f32
      %15 = vector.broadcast %cst : f32 to vector<128x128xf32>
      %c0 = arith.constant 0 : index
      %c0_3 = arith.constant 0 : index
      %16 = vector.load %arg16[%c0, %c0_3] : memref<128x128xf32, #tpu.memory_space<vmem>>, vector<128x128xf32>
      tpu.vector_store %arg16[%c0, %c0_3], %15 {strides = array<i32>} : memref<128x128xf32, #tpu.memory_space<vmem>>, vector<128x128xf32>,
    } else {
    }
    %3 = arith.index_cast %arg0 : i32 to index
    %4 = memref.load %arg3[%3] : memref<3xi32, #tpu.memory_space<smem>>
    %5 = arith.cmpi sge, %arg1, %4 : i32
    %6 = arith.index_cast %arg0 : i32 to index
    %7 = memref.load %arg4[%6] : memref<3xi32, #tpu.memory_space<smem>>
    %8 = arith.cmpi slt, %arg1, %7 : i32
    %9 = arith.andi %5, %8 : i1
    %10 = arith.extui %9 : i1 to i32
    %c0_i32_1 = arith.constant 0 : i32
    %11 = arith.cmpi ne, %10, %c0_i32_1 : i32
    scf.if %11 {
      %c128_i32 = arith.constant 128 : i32
      %15 = arith.muli %arg0, %c128_i32 : i32
      %16 = tpu.iota {dimensions = array<i32: 0>} : vector<128x512xi32>
      %17 = vector.broadcast %15 : i32 to vector<128x512xi32>
      %18 = arith.addi %17, %16 : vector<128x512xi32>
      %c0 = arith.constant 0 : index
      %c0_3 = arith.constant 0 : index
      %19 = vector.load %arg5[%c0, %c0_3] : memref<1x512xi32, #tpu.memory_space<vmem>>, vector<1x512xi32>
      %20 = vector.broadcast %19 : vector<1x512xi32> to vector<128x512xi32>
      %21 = arith.cmpi eq, %18, %20 : vector<128x512xi32>
      %22 = arith.extui %21 : vector<128x512xi1> to vector<128x512xi32>
      %23 = arith.sitofp %22 : vector<128x512xi32> to vector<128x512xf32>
      %c0_4 = arith.constant 0 : index
      %c0_5 = arith.constant 0 : index
      %24 = vector.load %arg16[%c0_4, %c0_5] : memref<128x128xf32, #tpu.memory_space<vmem>>, vector<128x128xf32>
      %c0_6 = arith.constant 0 : index
      %c0_7 = arith.constant 0 : index
      %25 = vector.load %arg7[%c0_6, %c0_7] : memref<512x128xf32, #tpu.memory_space<vmem>>, vector<512x128xf32>
      %cst = arith.constant dense<0.000000e+00> : vector<128x128xf32>
      %26 = tpu.matmul %23, %25, %cst {dimension_numbers = #tpu.dot_dimension_numbers<[1], [0], [0], [1], [0, 0, 1, 1], [], []>} : vector<128x512xf32>, vector<512x128xf32>, vector<128x128xf32> -> vector<128x128xf32>
      %27 = arith.addf %24, %26 : vector<128x128xf32>
      %c0_8 = arith.constant 0 : index
      %c0_9 = arith.constant 0 : index
      %28 = vector.load %arg16[%c0_8, %c0_9] : memref<128x128xf32, #tpu.memory_space<vmem>>, vector<128x128xf32>
      tpu.vector_store %arg16[%c0_8, %c0_9], %27 {strides = array<i32>} : memref<128x128xf32, #tpu.memory_space<vmem>>, vector<128x128xf32>,
    } else {
    }
    %c2_i32 = arith.constant 2 : i32
    %12 = arith.cmpi eq, %arg1, %c2_i32 : i32
    %13 = arith.extui %12 : i1 to i32
    %c0_i32_2 = arith.constant 0 : i32
    %14 = arith.cmpi ne, %13, %c0_i32_2 : i32
    scf.if %14 {
      %c0 = arith.constant 0 : index
      %c0_3 = arith.constant 0 : index
      %15 = vector.load %arg6[%c0, %c0_3] : memref<128x128xf32, #tpu.memory_space<vmem>>, vector<128x128xf32>
      %c0_4 = arith.constant 0 : index
      %c0_5 = arith.constant 0 : index
      %16 = vector.load %arg16[%c0_4, %c0_5] : memref<128x128xf32, #tpu.memory_space<vmem>>, vector<128x128xf32>
      %c0_6 = arith.constant 0 : index
      %c0_7 = arith.constant 0 : index
      %17 = vector.load %arg8[%c0_6, %c0_7] : memref<128x128xf32, #tpu.memory_space<vmem>>, vector<128x128xf32>
      %cst = arith.constant dense<0.000000e+00> : vector<128x128xf32>
      %18 = tpu.matmul %15, %17, %cst {dimension_numbers = #tpu.dot_dimension_numbers<[1], [0], [0], [1], [0, 0, 1, 1], [], []>} : vector<128x128xf32>, vector<128x128xf32>, vector<128x128xf32> -> vector<128x128xf32>
      %c0_8 = arith.constant 0 : index
      %c0_9 = arith.constant 0 : index
      %19 = vector.load %arg9[%c0_8, %c0_9] : memref<128x128xf32, #tpu.memory_space<vmem>>, vector<128x128xf32>
      %cst_10 = arith.constant dense<0.000000e+00> : vector<128x128xf32>
      %20 = tpu.matmul %16, %19, %cst_10 {dimension_numbers = #tpu.dot_dimension_numbers<[1], [0], [0], [1], [0, 0, 1, 1], [], []>} : vector<128x128xf32>, vector<128x128xf32>, vector<128x128xf32> -> vector<128x128xf32>
      %21 = arith.addf %18, %20 : vector<128x128xf32>
      %c0_11 = arith.constant 0 : index
      %c0_12 = arith.constant 0 : index
      %22 = vector.load %arg10[%c0_11, %c0_12] : memref<1x128xf32, #tpu.memory_space<vmem>>, vector<1x128xf32>
      %23 = vector.broadcast %22 : vector<1x128xf32> to vector<128x128xf32>
      %24 = arith.addf %21, %23 : vector<128x128xf32>
      %25 = arith.negf %24 : vector<128x128xf32>
      %26 = math.exp %25 : vector<128x128xf32>
      %cst_13 = arith.constant 1.000000e+00 : f32
      %27 = vector.broadcast %cst_13 : f32 to vector<128x128xf32>
      %28 = arith.addf %27, %26 : vector<128x128xf32>
      %29 = arith.divf %27, %28 : vector<128x128xf32>
      %30 = arith.mulf %24, %29 : vector<128x128xf32>
      %c0_14 = arith.constant 0 : index
      %c0_15 = arith.constant 0 : index
      %31 = vector.load %arg11[%c0_14, %c0_15] : memref<128x128xf32, #tpu.memory_space<vmem>>, vector<128x128xf32>
      %cst_16 = arith.constant dense<0.000000e+00> : vector<128x128xf32>
      %32 = tpu.matmul %30, %31, %cst_16 {dimension_numbers = #tpu.dot_dimension_numbers<[1], [0], [0], [1], [0, 0, 1, 1], [], []>} : vector<128x128xf32>, vector<128x128xf32>, vector<128x128xf32> -> vector<128x128xf32>
      %c0_17 = arith.constant 0 : index
      %c0_18 = arith.constant 0 : index
      %33 = vector.load %arg12[%c0_17, %c0_18] : memref<1x128xf32, #tpu.memory_space<vmem>>, vector<1x128xf32>
      %34 = vector.broadcast %33 : vector<1x128xf32> to vector<128x128xf32>
      %35 = arith.addf %32, %34 : vector<128x128xf32>
      %36 = tpu.iota {dimensions = array<i32: 1>} : vector<1x128xi32>
      %c32_i32 = arith.constant 32 : i32
      %37 = vector.broadcast %c32_i32 : i32 to vector<1x128xi32>
      %38 = arith.cmpi slt, %36, %37 : vector<1x128xi32>
      %39 = arith.extui %38 : vector<1x128xi1> to vector<1x128xi32>
      %40 = arith.sitofp %39 : vector<1x128xi32> to vector<1x128xf32>
      %cst_19 = arith.constant dense<0.000000e+00> : vector<128xf32>
      %41 = vector.multi_reduction <add>, %35, %cst_19 [1] : vector<128x128xf32> to vector<128xf32>
      %42 = vector.shape_cast %41 : vector<128xf32> to vector<128x1xf32>
      %cst_20 = arith.constant 3.125000e-02 : f32
      %43 = vector.broadcast %cst_20 : f32 to vector<128x1xf32>
      %44 = arith.mulf %42, %43 : vector<128x1xf32>
      %45 = vector.broadcast %44 : vector<128x1xf32> to vector<128x128xf32>
      %46 = arith.subf %35, %45 : vector<128x128xf32>
      %47 = vector.broadcast %40 : vector<1x128xf32> to vector<128x128xf32>
      %48 = arith.mulf %46, %47 : vector<128x128xf32>
      %49 = arith.mulf %48, %48 : vector<128x128xf32>
      %cst_21 = arith.constant dense<0.000000e+00> : vector<128xf32>
      %50 = vector.multi_reduction <add>, %49, %cst_21 [1] : vector<128x128xf32> to vector<128xf32>
      %51 = vector.shape_cast %50 : vector<128xf32> to vector<128x1xf32>
      %cst_22 = arith.constant 3.125000e-02 : f32
      %52 = vector.broadcast %cst_22 : f32 to vector<128x1xf32>
      %53 = arith.mulf %51, %52 : vector<128x1xf32>
      %cst_23 = arith.constant 9.99999974E-6 : f32
      %54 = vector.broadcast %cst_23 : f32 to vector<128x1xf32>
      %55 = arith.addf %53, %54 : vector<128x1xf32>
      %56 = math.rsqrt %55 : vector<128x1xf32>
      %57 = vector.broadcast %56 : vector<128x1xf32> to vector<128x128xf32>
      %58 = arith.mulf %48, %57 : vector<128x128xf32>
      %c0_24 = arith.constant 0 : index
      %c0_25 = arith.constant 0 : index
      %59 = vector.load %arg13[%c0_24, %c0_25] : memref<1x128xf32, #tpu.memory_space<vmem>>, vector<1x128xf32>
      %60 = vector.broadcast %59 : vector<1x128xf32> to vector<128x128xf32>
      %61 = arith.mulf %58, %60 : vector<128x128xf32>
      %c0_26 = arith.constant 0 : index
      %c0_27 = arith.constant 0 : index
      %62 = vector.load %arg14[%c0_26, %c0_27] : memref<1x128xf32, #tpu.memory_space<vmem>>, vector<1x128xf32>
      %63 = vector.broadcast %62 : vector<1x128xf32> to vector<128x128xf32>
      %64 = arith.addf %61, %63 : vector<128x128xf32>
      %65 = arith.addf %15, %64 : vector<128x128xf32>
      %c0_28 = arith.constant 0 : index
      %c0_29 = arith.constant 0 : index
      %66 = vector.load %arg15[%c0_28, %c0_29] : memref<128x128xf32, #tpu.memory_space<vmem>>, vector<128x128xf32>
      tpu.vector_store %arg15[%c0_28, %c0_29], %65 {strides = array<i32>} : memref<128x128xf32, #tpu.memory_space<vmem>>, vector<128x128xf32>,
    } else {
    }
    return
  }
  func.func @transform_0(%arg0: i32, %arg1: i32, %arg2: memref<3xi32, #tpu.memory_space<smem>>, %arg3: memref<3xi32, #tpu.memory_space<smem>>, %arg4: memref<3xi32, #tpu.memory_space<smem>>) -> (i32, i32) {
    %0 = arith.index_cast %arg0 : i32 to index
    %1 = memref.load %arg2[%0] : memref<3xi32, #tpu.memory_space<smem>>
    %2 = arith.addi %1, %arg1 : i32
    %c0_i32 = arith.constant 0 : i32
    %c0_i32_0 = arith.constant 0 : i32
    return %c0_i32, %2 : i32, i32
  }
  func.func @transform_1(%arg0: i32, %arg1: i32, %arg2: memref<3xi32, #tpu.memory_space<smem>>, %arg3: memref<3xi32, #tpu.memory_space<smem>>, %arg4: memref<3xi32, #tpu.memory_space<smem>>) -> (i32, i32) {
    %c0_i32 = arith.constant 0 : i32
    %c0_i32_0 = arith.constant 0 : i32
    return %arg0, %c0_i32 : i32, i32
  }
  func.func @transform_2(%arg0: i32, %arg1: i32, %arg2: memref<3xi32, #tpu.memory_space<smem>>, %arg3: memref<3xi32, #tpu.memory_space<smem>>, %arg4: memref<3xi32, #tpu.memory_space<smem>>) -> (i32, i32) {
    %0 = arith.index_cast %arg0 : i32 to index
    %1 = memref.load %arg2[%0] : memref<3xi32, #tpu.memory_space<smem>>
    %2 = arith.addi %1, %arg1 : i32
    %c0_i32 = arith.constant 0 : i32
    %c0_i32_0 = arith.constant 0 : i32
    return %2, %c0_i32 : i32, i32
  }
  func.func @transform_3(%arg0: i32, %arg1: i32, %arg2: memref<3xi32, #tpu.memory_space<smem>>, %arg3: memref<3xi32, #tpu.memory_space<smem>>, %arg4: memref<3xi32, #tpu.memory_space<smem>>) -> (i32, i32) {
    %c0_i32 = arith.constant 0 : i32
    %c0_i32_0 = arith.constant 0 : i32
    %c0_i32_1 = arith.constant 0 : i32
    return %c0_i32, %c0_i32_0 : i32, i32
  }
  func.func @transform_4(%arg0: i32, %arg1: i32, %arg2: memref<3xi32, #tpu.memory_space<smem>>, %arg3: memref<3xi32, #tpu.memory_space<smem>>, %arg4: memref<3xi32, #tpu.memory_space<smem>>) -> (i32, i32) {
    %c0_i32 = arith.constant 0 : i32
    %c0_i32_0 = arith.constant 0 : i32
    %c0_i32_1 = arith.constant 0 : i32
    return %c0_i32, %c0_i32_0 : i32, i32
  }
  func.func @transform_5(%arg0: i32, %arg1: i32, %arg2: memref<3xi32, #tpu.memory_space<smem>>, %arg3: memref<3xi32, #tpu.memory_space<smem>>, %arg4: memref<3xi32, #tpu.memory_space<smem>>) -> (i32, i32) {
    %c0_i32 = arith.constant 0 : i32
    %c0_i32_0 = arith.constant 0 : i32
    %c0_i32_1 = arith.constant 0 : i32
    return %c0_i32, %c0_i32_0 : i32, i32
  }
  func.func @transform_6(%arg0: i32, %arg1: i32, %arg2: memref<3xi32, #tpu.memory_space<smem>>, %arg3: memref<3xi32, #tpu.memory_space<smem>>, %arg4: memref<3xi32, #tpu.memory_space<smem>>) -> (i32, i32) {
    %c0_i32 = arith.constant 0 : i32
    %c0_i32_0 = arith.constant 0 : i32
    %c0_i32_1 = arith.constant 0 : i32
    return %c0_i32, %c0_i32_0 : i32, i32
  }
  func.func @transform_7(%arg0: i32, %arg1: i32, %arg2: memref<3xi32, #tpu.memory_space<smem>>, %arg3: memref<3xi32, #tpu.memory_space<smem>>, %arg4: memref<3xi32, #tpu.memory_space<smem>>) -> (i32, i32) {
    %c0_i32 = arith.constant 0 : i32
    %c0_i32_0 = arith.constant 0 : i32
    %c0_i32_1 = arith.constant 0 : i32
    return %c0_i32, %c0_i32_0 : i32, i32
  }
  func.func @transform_8(%arg0: i32, %arg1: i32, %arg2: memref<3xi32, #tpu.memory_space<smem>>, %arg3: memref<3xi32, #tpu.memory_space<smem>>, %arg4: memref<3xi32, #tpu.memory_space<smem>>) -> (i32, i32) {
    %c0_i32 = arith.constant 0 : i32
    %c0_i32_0 = arith.constant 0 : i32
    %c0_i32_1 = arith.constant 0 : i32
    return %c0_i32, %c0_i32_0 : i32, i32
  }
  func.func @transform_9(%arg0: i32, %arg1: i32, %arg2: memref<3xi32, #tpu.memory_space<smem>>, %arg3: memref<3xi32, #tpu.memory_space<smem>>, %arg4: memref<3xi32, #tpu.memory_space<smem>>) -> (i32, i32) {
    %c0_i32 = arith.constant 0 : i32
    %c0_i32_0 = arith.constant 0 : i32
    %c0_i32_1 = arith.constant 0 : i32
    return %c0_i32, %c0_i32_0 : i32, i32
  }
  func.func @transform_10(%arg0: i32, %arg1: i32, %arg2: memref<3xi32, #tpu.memory_space<smem>>, %arg3: memref<3xi32, #tpu.memory_space<smem>>, %arg4: memref<3xi32, #tpu.memory_space<smem>>) -> (i32, i32) {
    %c0_i32 = arith.constant 0 : i32
    %c0_i32_0 = arith.constant 0 : i32
    return %arg0, %c0_i32 : i32, i32
  }
}

</mosaic_0001>

<bundles_post_ra>
// kernel: tpu_custom_call.1
= control target key start
LH: loop header
LB: loop body
LE: loop exit
PB: predicated region body
PF: predicated region fallthrough
CT: control target
= control target key end

     0   :  { %s5047_s0 = inlined_call_operand.hbm [shape: s32[3], index: 0, kind: input, shape index: {}]   ;;  %s5048_s3 = inlined_call_operand.hbm [shape: s32[1,2048], index: 3, kind: input, shape index: {}]   ;;  %s5049_s4 = inlined_call_operand.hbm [shape: f32[384,128], index: 4, kind: input, shape index: {}]   ;;  %s5050_s5 = inlined_call_operand.hbm [shape: f32[2048,128], index: 5, kind: input, shape index: {}]   ;;  %s5051_s6 = inlined_call_operand.hbm [shape: f32[128,128], index: 6, kind: input, shape index: {}]   ;;  %s5052_s7 = inlined_call_operand.hbm [shape: f32[128,128], index: 7, kind: input, shape index: {}]   ;;  %s5053_s8 = inlined_call_operand.vmem [shape: f32[1,128], index: 8, kind: input, shape index: {}]   ;;  %s5054_s9 = inlined_call_operand.hbm [shape: f32[128,128], index: 9, kind: input, shape index: {}]   ;;  %s5055_s10 = inlined_call_operand.vmem [shape: f32[1,128], index: 10, kind: input, shape index: {}]   ;;  %s5056_s11 = inlined_call_operand.vmem [shape: f32[1,128], index: 11, kind: input, shape index: {}]   ;;  %s5057_s12 = inlined_call_operand.vmem [shape: f32[1,128], index: 12, kind: input, shape index: {}]   ;;  %s5058_s13 = inlined_call_operand.hbm [shape: f32[384,128], index: 13, kind: output, shape index: {}]   ;;  %s5059_s1 = inlined_call_operand.vmem [shape: s32[3], index: 1, kind: input, shape index: {}]   ;;  %s5060_s2 = inlined_call_operand.vmem [shape: s32[3], index: 2, kind: input, shape index: {}]  }
   0x1   :  { %5093 = sst [smem:[#allocation41_spill]] %s5049_s4  ;;  %s3394_s27 = scalar_lea.hbm %s5047_s0, 16 }
   0x2   :  { %5094 = sst [smem:[#allocation42_spill]] %s5051_s6  ;;  %p3395_p0 = scmp.ne.s32.totalorder %s5047_s0, %s3394_s27 }
   0x3   :  { %5095 = sst [smem:[#allocation43_spill]] %s5052_s7  ;;  %p3398_p1 = scmp.lt.u32.totalorder %s3394_s27, %s5047_s0 }
   0x4   :  { %5096 = sst [smem:[#allocation44_spill]] %s5053_s8 }
   0x5   :  { %5097 = sst [smem:[#allocation45_spill]] %s5054_s9  ;;  %p3400_p2 = pnand %p3398_p1, %p3395_p0 }
   0x6   :  { %5098 = sst [smem:[#allocation46_spill]] %s5055_s10 }
   0x7   :  { %5099 = sst [smem:[#allocation47_spill]] %s5056_s11 }
   0x8   :  { %5100 = sst [smem:[#allocation48_spill]] %s5057_s12 }
   0x9   :  { %5101 = sst [smem:[#allocation49_spill]] %s5058_s13 }
   0xa   :  { %3403 = shalt.err (!%p3400_p2)  }
   0xb   :  { %s3768_s15 = smov [#allocation4]   ;;  %s20_s20 = sshll.u32 %s5059_s1, 4  ;;  %s21_s20 = int_to_ptr.vmem [resolvable:$true] %s20_s20 }
   0xc   :  { %19 = dma.hbm_to_smem %s5047_s0, 16, %s3768_s15, [#allocation3] }
   0xd   :  { %s24_s23 = sshll.u32 %s5060_s2, 4  ;;  %s3404_s24 = scalar_lea.vmem %s21_s20, 16  ;;  %s25_s23 = int_to_ptr.vmem [resolvable:$true] %s24_s23 }
   0xe   :  { %p3405_p3 = scmp.ne.s32.totalorder %s21_s20, %s3404_s24  ;;  %p3409_p4 = scmp.lt.s32.totalorder %s21_s20, %s21_s20 }
   0xf   :  { %p3410_p5 = scmp.lt.s32.totalorder %s3404_s24, %s3404_s24 }
  0x11   :  { %p3411_p6 = por %p3410_p5, %p3409_p4 }
  0x13   :  { %p3412_p7 = pnand %p3411_p6, %p3405_p3 }
  0x15   :  { %3415 = shalt.err (!%p3412_p7)  }
  0x16   :  { %s3769_s25 = smov [#allocation5]   ;;  %s3416_s0 = scalar_lea.vmem %s25_s23, 16 }
  0x17   :  { %23 = dma.vmem_to_smem %s21_s20, 16, %s3769_s25, [#allocation3] }
  0x18   :  { %p3417_p8 = scmp.ne.s32.totalorder %s25_s23, %s3416_s0  ;;  %p3421_p9 = scmp.lt.s32.totalorder %s25_s23, %s25_s23 }
  0x19   :  { %p3422_p10 = scmp.lt.s32.totalorder %s3416_s0, %s3416_s0 }
  0x1b   :  { %p3423_p11 = por %p3422_p10, %p3421_p9 }
  0x1d   :  { %p3424_p12 = pnand %p3423_p11, %p3417_p8 }
  0x1f   :  { %3427 = shalt.err (!%p3424_p12)  }
  0x20   :  { %s3770_s1 = smov [#allocation6]  }
  0x21   :  { %27 = dma.vmem_to_smem %s25_s23, 16, %s3770_s1, [#allocation3] }
  0x22   :  { %3686 = dma.done.wait [#allocation3], 48 }
  0x23   :  { %3687 = vsyncadd [#allocation3], 4294967248 }
  0x24   :  { %29 = sfence }
  0x25   :  { %30 = vsyncpa [#allocation8], 0 }
  0x26   :  { %32 = vsyncpa [#allocation8 + $0x1], 0 }
  0x27   :  { %33 = vsyncpa [#allocation11], 0 }
  0x28   :  { %35 = vsyncpa [#allocation11 + $0x1], 0 }
  0x29   :  { %36 = vsyncpa [#allocation14], 0 }
  0x2a   :  { %37 = vsyncpa [#allocation17], 0 }
  0x2b   :  { %38 = vsyncpa [#allocation9], 0 }
  0x2c   :  { %40 = vsyncpa [#allocation9 + $0x1], 0  ;;  %s3873_s2 = smov 0   ;;  %s3875_s26 = smov 0  }
  0x2d   :  { %s3877_s27 = smov 0   ;;  %s3879_s28 = smov 0  }
  0x2e   :  { %s3881_s29 = smov 0   ;;  %s3883_s30 = smov 0  }
  0x2f   :  { %s3885_s14 = smov 0   ;;  %s3887_s15 = smov 0  }
  0x30   :  { %s3889_s16 = smov 0   ;;  %s3891_s17 = smov 0  }
  0x31   :  { %s3893_s18 = smov 0   ;;  %s3895_s19 = smov 0  }
  0x32   :  { %s3897_s20 = smov 0   ;;  %s3899_s21 = smov 0  }
  0x33 LB: > { %5102 = sst [smem:[#allocation30_spill]] %s3726_s28  ;;  %s3944_s22 = sadd.s32 4294967295, %s3766_s21   ;;  %s3766_s21 = sphi %s3899_s21, %s46_s21   ;;  %s3762_s20 = sphi %s3897_s20, %s5193_s20   ;;  %s3758_s19 = sphi %s3895_s19, %s5192_s19   ;;  %s3754_s18 = sphi %s3893_s18, %s5191_s18   ;;  %s3750_s17 = sphi %s3891_s17, %s5190_s17   ;;  %s3746_s16 = sphi %s3889_s16, %s5189_s16   ;;  %s3742_s15 = sphi %s3887_s15, %s5188_s15   ;;  %s3738_s14 = sphi %s3885_s14, %s5181_s14   ;;  %s3734_s30 = sphi %s3883_s30, %s5187_s30   ;;  %s3730_s29 = sphi %s3881_s29, %s5186_s29   ;;  %s3726_s28 = sphi %s3879_s28, %s5180_s28   ;;  %s3722_s27 = sphi %s3877_s27, %s5185_s27   ;;  %s3718_s26 = sphi %s3875_s26, %s5184_s26   ;;  %s3714_s2 = sphi %s3873_s2, %s5183_s2  }
  0x34   : > { %5103 = sst [smem:[#allocation31_spill]] %s3730_s29  ;;  %p2328_p13 = scmp.ge.s32.totalorder %s3766_s21, 1 }
  0x35   : > { %5104 = sst [smem:[#allocation32_spill]] %s3742_s15  ;;  %p5063_p0 = scmp.eq.s32.totalorder %s3944_s22, 0 }
  0x36   : > { %5105 = sst [smem:[#allocation33_spill]] %s3750_s17  ;;  %p322_p1 = scmp.lt.s32.totalorder %s3766_s21, 10 }
  0x37   : > { %5106 = sst [smem:[#allocation34_spill]] %s3754_s18  ;;  %s3771_s24 = smov [#allocation13]  }
  0x38   : > { %p3950_p3 = pnand %p2328_p13, %p322_p1  ;;  %s334_s25 = sshll.u32 %s3771_s24, 4  ;;  %s335_s25 = int_to_ptr.vmem [resolvable:$true] %s334_s25 }
  0x39   : > { %s5110_s6 = sld [smem:[#allocation42_spill]] }
  0x3a   : > { %s5107_s23 = scalar_select %p3950_p3, 1, 0 }
  0x3b   : > { %p3135_p4 = pneg %p3950_p3 }
  0x3c   : > { %5108 = sst [smem:[#allocation35_spill]] %s5107_s23 }
  0x3d   : > { %p3958_p5 = pnand %p3135_p4, %p5063_p0 }
  0x3f   : > { %s5109_s0 = scalar_select %p3958_p5, 1, 0 }
  0x40   : > { %s3428_s12 = scalar_lea.hbm %s5110_s6, 2048  ;;  %p3970_p7 = pneg %p3958_p5 }
  0x41   : > { %p3429_p6 = scmp.ne.s32.totalorder %s5110_s6, %s3428_s12  ;;  %p3435_p10 = scmp.lt.u32.totalorder %s3428_s12, %s5110_s6 }
  0x43   : > { %p3431_p8 = pnand %p3970_p7, %p3429_p6 }
  0x45   : > { %p3432_p9 = pneg %p3431_p8 }
  0x47   : > { %p3437_p11 = pnand %p3435_p10, %p3432_p9 }
  0x49   : > { %3440 = shalt.err (!%p3437_p11)
}
  0x4a   : > { %s3441_s13 = scalar_lea.vmem %s335_s25, 2048  ;;  %p3449_p4 = scmp.lt.s32.totalorder %s335_s25, %s335_s25 }
  0x4b   : > { %p3442_p12 = scmp.ne.s32.totalorder %s335_s25, %s3441_s13  ;;  %p3450_p0 = scmp.lt.s32.totalorder %s3441_s13, %s3441_s13 }
  0x4d   : > { %p3444_p13 = pnand %p3442_p12, %p3970_p7  ;;  %p3451_p2 = por %p3450_p0, %p3449_p4 }
  0x4f   : > { %p3445_p1 = pneg %p3444_p13 }
  0x51   : > { %p3452_p3 = pnand %p3451_p2, %p3445_p1 }
  0x53   : > { %3455 = shalt.err (!%p3452_p3)
}
  0x54   : > { %s5065_s10 = smov 128   ;;  %s5067_s8 = smov 8  }
  0x55   : > { %3138 = dma.hbm_to_vmem [thread:$0]  (!%p3958_p5), %s5110_s6, 2048, %s335_s25, [#allocation14], %s5065_s10, %s5065_s10, %s5067_s8  }
  0x56   : > { %s2327_s18 = sadd.s32 4294967294, %s3766_s21   ;;  %p5080_p0 = scmp.eq.s32.totalorder %s3766_s21, 0 }
  0x57   : > { %p102_p2 = scmp.ne.s32.totalorder %s3734_s30, %s3730_s29  ;;  %p108_p3 = scmp.ne.s32.totalorder %s3730_s29, %s3726_s28 }
  0x58   : > { %p315_p6 = scmp.eq.s32.totalorder %s2327_s18, 8  ;;  %p5112_p9 = scmp.eq.s32.totalorder %s3944_s22, 8 }
  0x59   : > { %p104_p8 = por %p102_p2, %p5080_p0  ;;  %p5115_p11 = scmp.eq.s32.totalorder %s3944_s22, 0 }
  0x5a   : > { %p3999_p10 = por %p5112_p9, %p102_p2  ;;  %p4009_p13 = por %p315_p6, %p108_p3 }
  0x5b   : > { %p4005_p12 = por %p108_p3, %p5115_p11  ;;  %p5079_p1 = scmp.lt.s32.totalorder %s3766_s21, 9 }
  0x5c   : > { %s5113_s1 = scalar_select %p3999_p10, 1, 0 }
  0x5d   : > { %s5116_s13 = scalar_select %p4005_p12, 1, 0 }
  0x5e   : > { %5114 = sst [smem:[#allocation36_spill]] %s5113_s1  ;;  %s407_s11 = sand.u32 1, %s3766_s21  }
  0x5f   : > { %5117 = sst [smem:[#allocation37_spill]] %s5116_s13  ;;  %s409_s12 = sand.u32 1, %s3734_s30  }
  0x60   : > { %s5118_s25 = scalar_select %p4009_p13, 1, 0 }
  0x61   : > { %s2336_s18 = sshll.u32 %s409_s12, 7  ;;  %s2508_s10 = sshll.u32 %s3762_s20, 11 }
  0x62   : > { %5119 = sst [smem:[#allocation38_spill]] %s5118_s25  ;;  %s5120_s4 = sld [smem:[#allocation41_spill]] }
  0x63   : > { %s411_s1 = scalar_lea.vmem [#allocation10], %s2336_s18  ;;  %p4024_p4 = pnand %p5079_p1, %p104_p8 }
  0x64   : > { %s418_s17 = sshll.u32 %s411_s1, 4  ;;  %s3774_s12 = smov [#allocation15]   ;;  %s4028_s17 = int_to_ptr.vmem [resolvable:$true] %s418_s17 }
  0x65   : > { %s4030_s25 = sshll.u32 %s3774_s12, 4  ;;  %s4032_s6 = scalar_lea.sflag [#allocation11], %s407_s11  ;;  %s348_s25 = int_to_ptr.vmem [resolvable:$true] %s4030_s25 }
  0x66   : > { %5122 = sst [smem:[#allocation39_spill]] %s4032_s6  ;;  %p3458_p3 = pneg %p4024_p4 }
  0x68   : > { %s4020_s28 = scalar_lea.hbm %s5120_s4, %s2508_s10  ;;  %s3461_s18 = scalar_lea.hbm %s5120_s4, 6144 }
  0x69   : > { %s3456_s10 = scalar_lea.hbm %s4020_s28, 2048  ;;  %p3462_p9 = scmp.lt.u32.totalorder %s4020_s28, %s5120_s4 }
  0x6a   : > { %p3457_p2 = scmp.ne.s32.totalorder %s4020_s28, %s3456_s10  ;;  %p3463_p11 = scmp.lt.u32.totalorder %s3461_s18, %s3456_s10 }
  0x6b   : > { %p3465_p0 = scmp.lt.u32.totalorder %s3456_s10, %s4020_s28 }
  0x6c   : > { %p3459_p6 = pnand %p3458_p3, %p3457_p2  ;;  %p3464_p1 = por %p3463_p11, %p3462_p9 }
  0x6e   : > { %p3460_p8 = pneg %p3459_p6  ;;  %p3466_p13 = por %p3465_p0, %p3464_p1 }
  0x70   : > { %p3467_p10 = pnand %p3466_p13, %p3460_p8 }
  0x72   : > { %3470 = shalt.err (!%p3467_p10)
}
  0x73   : > { %s3471_s11 = scalar_lea.vmem %s4028_s17, 2048  ;;  %s3775_s12 = smov [#allocation10]  }
  0x74   : > { %p3472_p2 = scmp.ne.s32.totalorder %s4028_s17, %s3471_s11  ;;  %s3476_s8 = sshll.u32 %s3775_s12, 4  ;;  %s3477_s8 = int_to_ptr.vmem [resolvable:$false] %s3476_s8 }
  0x75   : > { %s3478_s29 = scalar_lea.vmem %s3477_s8, 4096  ;;  %p3479_p5 = scmp.lt.s32.totalorder %s4028_s17, %s3477_s8 }
  0x76   : > { %p3474_p6 = pnand %p3472_p2, %p3458_p3  ;;  %p3480_p9 = scmp.lt.s32.totalorder %s3478_s29, %s3471_s11 }
  0x78   : > { %p3475_p12 = pneg %p3474_p6  ;;  %p3481_p11 = por %p3480_p9, %p3479_p5 }
  0x7a   : > { %p3482_p0 = pnand %p3481_p11, %p3475_p12 }
  0x7c   : > { %3485 = shalt.err (!%p3482_p0)
}
  0x7d   : > { %s5123_s23 = smov 8   ;;  %s5124_s10 = smov 128  }
  0x7e   : > { %3153 = dma.hbm_to_vmem [thread:$0]  (!%p4024_p4), %s4020_s28, 2048, %s4028_s17, %s4032_s6, %s5124_s10, %s5124_s10, %s5123_s23  }
  0x7f   : > { %s5125_s7 = sld [smem:[#allocation43_spill]] }
  0x85   : > { %s3486_s12 = scalar_lea.hbm %s5125_s7, 2048 }
  0x86   : > { %p3487_p5 = scmp.ne.s32.totalorder %s5125_s7, %s3486_s12  ;;  %p3493_p13 = scmp.lt.u32.totalorder %s3486_s12, %s5125_s7 }
  0x88   : > { %p3489_p10 = pnand %p3487_p5, %p3970_p7 }
  0x8a   : > { %p3490_p12 = pneg %p3489_p10 }
  0x8c   : > { %p3495_p1 = pnand %p3493_p13, %p3490_p12 }
  0x8e   : > { %3498 = shalt.err (!%p3495_p1)
}
  0x8f   : > { %s3499_s4 = scalar_lea.vmem %s348_s25, 2048  ;;  %p3507_p2 = scmp.lt.s32.totalorder %s348_s25, %s348_s25 }
  0x90   : > { %p3500_p4 = scmp.ne.s32.totalorder %s348_s25, %s3499_s4  ;;  %p3508_p6 = scmp.lt.s32.totalorder %s3499_s4, %s3499_s4 }
  0x92   : > { %p3502_p3 = pnand %p3500_p4, %p3970_p7  ;;  %p3509_p9 = por %p3508_p6, %p3507_p2 }
  0x94   : > { %p3503_p8 = pneg %p3502_p3 }
  0x96   : > { %p3510_p11 = pnand %p3509_p9, %p3503_p8 }
  0x98   : > { %3513 = shalt.err (!%p3510_p11)
}
  0x99   : > { %p5126_p0 = scmp.ne.s32.totalorder %s5109_s0, 0  ;;  %s3776_s1 = smov [#allocation16]  }
  0x9a   : > { %s363_s18 = sshll.u32 %s3776_s1, 4  ;;  %s5127_s9 = sld [smem:[#allocation45_spill]]  ;;  %s364_s18 = int_to_ptr.vmem [resolvable:$true] %s363_s18 }
  0x9b   : > { %3141 = dma.hbm_to_vmem [thread:$0]  (!%p5126_p0), %s5125_s7, 2048, %s348_s25, [#allocation14], %s5124_s10, %s5124_s10, %s5123_s23  }
  0xa0   : > { %s3514_s4 = scalar_lea.hbm %s5127_s9, 2048 }
  0xa1   : > { %p3515_p5 = scmp.ne.s32.totalorder %s5127_s9, %s3514_s4  ;;  %p3521_p13 = scmp.lt.u32.totalorder %s3514_s4, %s5127_s9 }
  0xa3   : > { %p3517_p10 = pnand %p3515_p5, %p3970_p7 }
  0xa5   : > { %p3518_p12 = pneg %p3517_p10 }
  0xa7   : > { %p3523_p1 = pnand %p3521_p13, %p3518_p12 }
  0xa9   : > { %3526 = shalt.err (!%p3523_p1)
}
  0xaa   : > { %s3527_s25 = scalar_lea.vmem %s364_s18, 2048  ;;  %p3535_p2 = scmp.lt.s32.totalorder %s364_s18, %s364_s18 }
  0xab   : > { %p3528_p4 = scmp.ne.s32.totalorder %s364_s18, %s3527_s25  ;;  %p3536_p6 = scmp.lt.s32.totalorder %s3527_s25, %s3527_s25 }
  0xad   : > { %p3530_p3 = pnand %p3528_p4, %p3970_p7  ;;  %p3537_p9 = por %p3536_p6, %p3535_p2 }
  0xaf   : > { %p3531_p8 = pneg %p3530_p3 }
  0xb1   : > { %p3538_p11 = pnand %p3537_p9, %p3531_p8 }
  0xb3   : > { %3541 = shalt.err (!%p3538_p11)
}
  0xb4   : > { %3144 = dma.hbm_to_vmem [thread:$0]  (!%p5126_p0), %s5127_s9, 2048, %s364_s18, [#allocation17], %s5124_s10, %s5124_s10, %s5123_s23  }
  0xb5   : > { %s95_s0 = sadd.s32 1, %s3734_s30  ;;  %s55_s24 = sadd.s32 1, %s3758_s19 }
  0xb6   : > { %p56_p7 = scmp.ge.s32.totalorder %s55_s24, 3  ;;  %s58_s17 = sadd.s32 1, %s3762_s20 }
  0xb7   : > { %s62_s1 = sld [smem:[#allocation4 + %s3762_s20]]  ;;  %p76_p5 = scmp.ne.s32.totalorder %s3746_s16, %s3742_s15 }
  0xb8   : > { %s5195_s24 = smov (%p56_p7, %s55_s24), 0  ;;  %s5197_s17 = smov (!%p56_p7, %s58_s17), %s3762_s20 }
  0xb9   : > { %s69_s12 = sadd.s32 1, %s3746_s16  ;;  %p82_p10 = scmp.ne.s32.totalorder %s3742_s15, %s3738_s14 }
  0xba   : > { %p60_p0 = scmp.ge.s32.totalorder %s5197_s17, 3  ;;  %s118_s18 = sld [smem:[#allocation4 + %s3762_s20]] }
  0xbb   : > { %p5128_p12 = scmp.eq.s32.totalorder %s3766_s21, 0  ;;  %p5130_p1 = scmp.eq.s32.totalorder %s3944_s22, 0 }
  0xbc   : > { %s5199_s17 = smov (%p60_p0, %s5197_s17), 0  ;;  %s5090_s14 = sand.u32 1, %s3746_s16  }
  0xbd   : > { %p4121_p13 = por %p5128_p12, %p76_p5  ;;  %p4127_p4 = por %p5130_p1, %p82_p10 }
  0xbe   : > { %p5133_p3 = scmp.lt.s32.totalorder %s3766_s21, 9  ;;  %s64_s13 = sld [smem:[#allocation4 + %s5199_s17]] }
  0xbf   : > { %s5131_s4 = scalar_select %p4127_p4, 1, 0 }
  0xc0   : > { %p4138_p8 = pnand %p5133_p3, %p4121_p13  ;;  %s92_s29 = ssub.s32 %s3762_s20, %s5199_s17 }
  0xc1   : > { %5132 = sst [smem:[#allocation40_spill]] %s5131_s4  ;;  %p93_p2 = scmp.eq.s32.totalorder %s92_s29, 0 }
  0xc2   : > { %s120_s25 = sld [smem:[#allocation4 + %s5199_s17]]  ;;  %s63_s6 = sadd.s32 %s3758_s19, %s62_s1 }
  0xc3   : > { %s119_s28 = sadd.s32 %s3758_s19, %s118_s18  ;;  %s2333_s9 = sshll.u32 %s5090_s14, 2 }
  0xc4   : > { %s4149_s7 = scalar_select %p93_p2, %s3734_s30, %s95_s0  }
  0xc5   : > { %s65_s4 = sadd.s32 %s64_s13, %s5195_s24  ;;  %s390_s1 = scalar_lea.vmem [#allocation7], %s2333_s9 }
  0xc6   : > { %s66_s15 = ssub.s32 %s63_s6, %s65_s4  ;;  %s400_s0 = sshll.u32 %s390_s1, 4  ;;  %s4173_s0 = int_to_ptr.vmem [resolvable:$true] %s400_s0 }
  0xc7   : > { %p67_p6 = scmp.eq.s32.totalorder %s66_s15, 0  ;;  %p5135_p11 = pmov %p5133_p3 }
  0xc8   : > { %s121_s10 = sadd.s32 %s120_s25, %s5195_s24  ;;  %p5136_p7 = pmov %p5133_p3 }
  0xc9   : > { %s122_s29 = ssub.s32 %s119_s28, %s121_s10  ;;  %s125_s10 = sadd.s32 1, %s3722_s27 }
  0xca   : > { %p123_p9 = scmp.eq.s32.totalorder %s122_s29, 0  ;;  %p132_p5 = scmp.ne.s32.totalorder %s3722_s27, %s3718_s26 }
  0xcb   : > { %s4156_s18 = scalar_select %p67_p6, %s3746_s16, %s69_s12  }
  0xcc   : > { %s3117_s14 = scalar_select %p4121_p13, [#allocation4], [#allocation19] }
  0xcd   : > { %s3118_s13 = scalar_select %p4121_p13, %s3762_s20, 0 }
  0xce   : > { %s5201_s14 = smov (!%p5135_p11, %s3117_s14), [#allocation21]  ;;  %p138_p10 = scmp.ne.s32.totalorder %s3718_s26, %s3714_s2 }
  0xcf   : > { %s5203_s13 = smov (!%p5136_p7, %s3118_s13), 0  ;;  %p5137_p0 = pmov %p5128_p12 }
  0xd0   : > { %s391_s15 = sld [smem:[%s5201_s14 + %s5203_s13]]  ;;  %s430_s12 = sand.u32 1, %s3722_s27  }
  0xd1   : > { %s4171_s4 = scalar_select %p123_p9, %s3722_s27, %s125_s10  }
  0xd2   : > { %p4179_p12 = por %p132_p5, %p5137_p0  ;;  %p5139_p13 = pmov %p5130_p1 }
  0xd3   : > { %s4196_s2 = sshll.u32 %s430_s12, 9  ;;  %s5141_s1 = sand.u32 1, %s3746_s16  }
  0xd4   : > { %p4187_p1 = por %p138_p10, %p5139_p13  ;;  %s387_s13 = scalar_lea.sflag [#allocation8], %s5141_s1 }
  0xd5   : > { %p3544_p2 = pneg %p4138_p8 }
  0xd6   : > { %s392_s11 = sadd.s32 %s3758_s19, %s391_s15 }
  0xd7   : > { %s5140_s25 = scalar_select %p4187_p1, 1, 0 }
  0xd8   : > { %s2507_s14 = sshll.u32 %s392_s11, 6 }
  0xd9   : > { %s4194_s29 = scalar_lea.hbm %s5048_s3, %s2507_s14  ;;  %s3547_s14 = scalar_lea.hbm %s5048_s3, 256 }
  0xda   : > { %s3542_s15 = scalar_lea.hbm %s4194_s29, 64  ;;  %p3548_p11 = scmp.lt.u32.totalorder %s4194_s29, %s5048_s3 }
  0xdb   : > { %p3543_p3 = scmp.ne.s32.totalorder %s4194_s29, %s3542_s15  ;;  %p3549_p7 = scmp.lt.u32.totalorder %s3547_s14, %s3542_s15 }
  0xdc   : > { %p3551_p10 = scmp.lt.u32.totalorder %s3542_s15, %s4194_s29 }
  0xdd   : > { %p3545_p6 = pnand %p3544_p2, %p3543_p3  ;;  %p3550_p5 = por %p3549_p7, %p3548_p11 }
  0xdf   : > { %p3546_p9 = pneg %p3545_p6  ;;  %p3552_p0 = por %p3551_p10, %p3550_p5 }
  0xe1   : > { %p3553_p13 = pnand %p3552_p0, %p3546_p9 }
  0xe3   : > { %3556 = shalt.err (!%p3553_p13)
}
  0xe4   : > { %s3557_s12 = scalar_lea.vmem %s4173_s0, 64  ;;  %s3777_s1 = smov [#allocation7]  }
  0xe5   : > { %p3558_p3 = scmp.ne.s32.totalorder %s4173_s0, %s3557_s12  ;;  %s3562_s10 = sshll.u32 %s3777_s1, 4  ;;  %s3563_s10 = int_to_ptr.vmem [resolvable:$false] %s3562_s10 }
  0xe6   : > { %s3564_s11 = scalar_lea.vmem %s3563_s10, 128  ;;  %p3565_p4 = scmp.lt.s32.totalorder %s4173_s0, %s3563_s10 }
  0xe7   : > { %p3560_p6 = pnand %p3558_p3, %p3544_p2  ;;  %p3566_p11 = scmp.lt.s32.totalorder %s3564_s11, %s3557_s12 }
  0xe9   : > { %p3561_p1 = pneg %p3560_p6  ;;  %p3567_p7 = por %p3566_p11, %p3565_p4 }
  0xeb   : > { %p3568_p5 = pnand %p3567_p7, %p3561_p1 }
  0xed   : > { %3571 = shalt.err (!%p3568_p5)
}
  0xee   : > { %3150 = dma.hbm_to_vmem [thread:$0]  (!%p4138_p8), %s4194_s29, 64, %s4173_s0, %s387_s13  }
  0xef   : > { %s3121_s15 = scalar_select %p4179_p12, [#allocation4], [#allocation20] }
  0xf0   : > { %s3122_s14 = scalar_select %p4179_p12, %s3762_s20, 0 }
  0xf1   : > { %p5142_p4 = scmp.lt.s32.totalorder %s3766_s21, 9  ;;  %s432_s28 = scalar_lea.vmem [#allocation12], %s4196_s2 }
  0xf2   : > { %s441_s12 = sshll.u32 %s432_s28, 4  ;;  %s4244_s12 = int_to_ptr.vmem [resolvable:$true] %s441_s12 }
  0xf3   : > { %s5205_s15 = smov (!%p5142_p4, %s3121_s15), [#allocation22]  ;;  %p5143_p1 = pmov %p5142_p4 }
  0xf5   : > { %s5207_s14 = smov (!%p5143_p1, %s3122_s14), 0  ;;  %p5144_p2 = pmov %p5143_p1 }
  0xf6   : > { %s433_s6 = sld [smem:[%s5205_s15 + %s5207_s14]]  ;;  %s3577_s15 = scalar_lea.hbm %s5050_s5, 32768 }
  0xf7   : > { %p4238_p9 = pnand %p5144_p2, %p4179_p12 }
  0xf9   : > { %p3574_p12 = pneg %p4238_p9 }
  0xfc   : > { %s434_s0 = sadd.s32 %s3758_s19, %s433_s6 }
  0xfd   : > { %s2509_s29 = sshll.u32 %s434_s0, 13 }
  0xfe   : > { %s4249_s10 = scalar_lea.hbm %s5050_s5, %s2509_s29 }
  0xff   : > { %s3572_s9 = scalar_lea.hbm %s4249_s10, 8192  ;;  %p3578_p13 = scmp.lt.u32.totalorder %s4249_s10, %s5050_s5 }
 0x100   : > { %p3573_p8 = scmp.ne.s32.totalorder %s4249_s10, %s3572_s9  ;;  %p3579_p3 = scmp.lt.u32.totalorder %s3577_s15, %s3572_s9 }
 0x101   : > { %p3581_p11 = scmp.lt.u32.totalorder %s3572_s9, %s4249_s10 }
 0x102   : > { %p3575_p10 = pnand %p3574_p12, %p3573_p8  ;;  %p3580_p6 = por %p3579_p3, %p3578_p13 }
 0x104   : > { %p3576_p0 = pneg %p3575_p10  ;;  %p3582_p7 = por %p3581_p11, %p3580_p6 }
 0x106   : > { %p3583_p5 = pnand %p3582_p7, %p3576_p0 }
 0x108   : > { %3586 = shalt.err (!%p3583_p5)
}
 0x109   : > { %s3587_s28 = scalar_lea.vmem %s4244_s12, 8192  ;;  %s3778_s0 = smov [#allocation12]  }
 0x10a   : > { %p3588_p4 = scmp.ne.s32.totalorder %s4244_s12, %s3587_s28  ;;  %s3592_s29 = sshll.u32 %s3778_s0, 4  ;;  %s3593_s29 = int_to_ptr.vmem [resolvable:$false] %s3592_s29 }
 0x10b   : > { %s3594_s13 = scalar_lea.vmem %s3593_s29, 16384  ;;  %p3595_p8 = scmp.lt.s32.totalorder %s4244_s12, %s3593_s29 }
 0x10c   : > { %p3590_p1 = pnand %p3588_p4, %p3574_p12  ;;  %p3596_p10 = scmp.lt.s32.totalorder %s3594_s13, %s3587_s28 }
 0x10e   : > { %p3591_p2 = pneg %p3590_p1  ;;  %p3597_p13 = por %p3596_p10, %p3595_p8 }
 0x110   : > { %p3598_p3 = pnand %p3597_p13, %p3591_p2 }
 0x112   : > { %3601 = shalt.err (!%p3598_p3)
}
 0x113   : > { %s5146_s1 = smov 128   ;;  %s5147_s9 = sld [smem:[#allocation39_spill]] }
 0x114   : > { %s5148_s2 = sld [smem:[#allocation35_spill]] }
 0x119   : > { %3158 = dma.hbm_to_vmem [thread:$0]  (!%p4238_p9), %s4249_s10, 8192, %s4244_s12, %s5147_s9, %s5146_s1, %s5146_s1, %s5123_s23  }
 0x11a   : > { %p5149_p12 = scmp.ne.s32.totalorder %s5148_s2, 0 }
 0x11b   : > { %s5150_s11 = sld [smem:[#allocation32_spill]] (!%p5149_p12)  ;;  %s5151_s15 = sld [smem:[#allocation40_spill]] (!%p5149_p12) }
 0x11c   : > { %453 = sbr.rel (%p5149_p12) target bundleno = 1572 (0x624), region = 60 }
 0x121   : > { %s455_s14 = sand.u32 (!%p5149_p12), 1, %s5150_s11   ;;  %p5152_p0 = scmp.ne.s32.totalorder (!%p5149_p12), %s5151_s15, 0 }
 0x122   : > { %s4283_s6 = sshll.u32 (!%p5149_p12), %s455_s14, 2  ;;  %s456_s28 = scalar_lea.sflag (!%p5149_p12), [#allocation8], %s455_s14 }
 0x123   : > { %s459_s0 = scalar_lea.vmem [#allocation7], %s4283_s6 }
 0x124   : > { %3689 = dma.done.wait (%p5152_p0), %s456_s28, 64  }
 0x125   : > { %3691 = vsyncadd (%p5152_p0), %s456_s28, 4294967232  ;;  %s5153_s8 = sld [smem:[#allocation31_spill]]  ;;  %s5154_s23 = sld [smem:[#allocation37_spill]] }
 0x126   : > { %s464_s12 = sand.u32 1, %s3944_s22  }
 0x127   : > { %s465_s13 = scalar_lea.sflag [#allocation11], %s464_s12 }
 0x12b   : > { %s466_s10 = sand.u32 1, %s5153_s8   ;;  %p5155_p9 = scmp.ne.s32.totalorder %s5154_s23, 0 }
 0x12c   : > { %s2344_s29 = sshll.u32 %s466_s10, 7 }
 0x12d   : > { %s4294_s1 = scalar_lea.vmem [#allocation10], %s2344_s29 }
 0x12e   : > { %3693 = dma.done.wait (%p5155_p9), %s465_s13, 2048  }
 0x12f   : > { %3695 = vsyncadd (%p5155_p9), %s465_s13, 4294965248  ;;  %s475_s9 = sand.u32 1, %s3718_s26   ;;  %p5156_p6 = scmp.ne.s32.totalorder %s5140_s25, 0 }
 0x130   : > { %s2345_s2 = sshll.u32 %s475_s9, 9 }
 0x131   : > { %s4301_s11 = scalar_lea.vmem [#allocation12], %s2345_s2 }
 0x132   : > { %3697 = dma.done.wait (%p5156_p6), %s465_s13, 8192  }
 0x133   : > { %3699 = vsyncadd (%p5156_p6), %s465_s13, 4294959104  ;;  %p5157_p11 = scmp.eq.s32.totalorder %s3944_s22, 0 }
 0x135   : > { %3701 = dma.done.wait (%p5157_p11), [#allocation14], 4096   ;;  %p5158_p7 = pmov %p5157_p11 }
 0x137   : > { %3703 = vsyncadd (%p5158_p7), [#allocation14], 4294963200  ;;  %p5159_p5 = pmov %p5158_p7 }
 0x139   : > { %3705 = dma.done.wait (%p5159_p5), [#allocation17], 2048   ;;  %p5160_p4 = pmov %p5159_p5 }
 0x13a   : > { %s4315_s15 = scalar_lea.vmem [#allocation18], %s2344_s29  ;;  %s5161_s14 = sld [smem:[#allocation33_spill]] }
 0x13b   : > { %3707 = vsyncadd (%p5160_p4), [#allocation17], 4294965248 }
 0x140   : > { %p2350_p1 = scmp.ne.s32.totalorder %s5161_s14, 0 }
 0x141   : > { %v3779_v0 = vmov (!%p2350_p1), 0.0  }
 0x142   : > { %547 = sbr.rel (%p2350_p1) target bundleno = 330 (0x14a), region = 88  ;;  %548 = vst [vmem:[#allocation2] sm:$0xff] (!%p2350_p1), %v3779_v0  ;;  %549 = vst [vmem:[#allocation2 + $0x8] sm:$0xff] (!%p2350_p1), %v3779_v0 }
 0x143   : > { %550 = vst [vmem:[#allocation2 + $0x10] sm:$0xff] (!%p2350_p1), %v3779_v0  ;;  %551 = vst [vmem:[#allocation2 + $0x18] sm:$0xff] (!%p2350_p1), %v3779_v0 }
 0x144   : > { %552 = vst [vmem:[#allocation2 + $0x20] sm:$0xff] (!%p2350_p1), %v3779_v0  ;;  %553 = vst [vmem:[#allocation2 + $0x28] sm:$0xff] (!%p2350_p1), %v3779_v0 }
 0x145   : > { %554 = vst [vmem:[#allocation2 + $0x30] sm:$0xff] (!%p2350_p1), %v3779_v0  ;;  %555 = vst [vmem:[#allocation2 + $0x38] sm:$0xff] (!%p2350_p1), %v3779_v0 }
 0x146   : > { %556 = vst [vmem:[#allocation2 + $0x40] sm:$0xff] (!%p2350_p1), %v3779_v0  ;;  %557 = vst [vmem:[#allocation2 + $0x48] sm:$0xff] (!%p2350_p1), %v3779_v0 }
 0x147   : > { %558 = vst [vmem:[#allocation2 + $0x50] sm:$0xff] (!%p2350_p1), %v3779_v0  ;;  %559 = vst [vmem:[#allocation2 + $0x58] sm:$0xff] (!%p2350_p1), %v3779_v0 }
 0x148   : > { %560 = vst [vmem:[#allocation2 + $0x60] sm:$0xff] (!%p2350_p1), %v3779_v0  ;;  %561 = vst [vmem:[#allocation2 + $0x68] sm:$0xff] (!%p2350_p1), %v3779_v0 }
 0x149   : > { %562 = vst [vmem:[#allocation2 + $0x70] sm:$0xff] %v3779_v0  ;;  %563 = vst [vmem:[#allocation2 + $0x78] sm:$0xff] %v3779_v0 }
 0x14a PF: > { %s5162_s22 = sld [smem:[#allocation34_spill]]  ;;  %s5163_s25 = sld [smem:[#allocation33_spill]] }
 0x150   : > { %s564_s28 = sld [smem:[#allocation5 + %s5162_s22]] }
 0x151   : > { %s566_s8 = sld [smem:[#allocation6 + %s5162_s22]] }
 0x156   : > { %p565_p2 = scmp.ge.s32.totalorder %s5163_s25, %s564_s28 }
 0x157   : > { %p567_p8 = scmp.lt.s32.totalorder %s5163_s25, %s566_s8 }
 0x159   : > { %p568_p10 = pnand %p567_p8, %p565_p2 }
 0x15a   : > { %v848_v1 = vld [vmem:[%s4301_s11 + $0x80] sm:$0xff] (!%p568_p10)  ;;  %v849_v2 = vld [vmem:[%s4301_s11 + $0x88] sm:$0xff] (!%p568_p10)  ;;  %v850_v12 = vld [vmem:[%s4301_s11 + $0x90] sm:$0xff] (!%p568_p10)  ;;  %v573_v48 = vlaneseq (!%p568_p10)  ;;  %s5164_s23 = sld [smem:[#allocation34_spill]] (!%p568_p10) }
 0x15b   : > { %571 = sbr.rel (%p568_p10) target bundleno = 663 (0x297), region = 92  ;;  %v880_v3 = vld [vmem:[%s4301_s11 + $0x180] sm:$0xff] (!%p568_p10)  ;;  %v2935_v4 = vpack.c.bf16 (!%p568_p10), %v849_v2, %v848_v1  ;;  %v881_v5 = vld [vmem:[%s4301_s11 + $0x188] sm:$0xff] (!%p568_p10)  ;;  %v851_v14 = vld [vmem:[%s4301_s11 + $0x98] sm:$0xff] (!%p568_p10) }
 0x15c   : > { %v832_v6 = vld [vmem:[%s4301_s11] sm:$0xff] (!%p568_p10)  ;;  %v833_v7 = vld [vmem:[%s4301_s11 + $0x8] sm:$0xff] (!%p568_p10)  ;;  %v2967_v8 = vpack.c.bf16 (!%p568_p10), %v881_v5, %v880_v3  ;;  %v882_v15 = vld [vmem:[%s4301_s11 + $0x190] sm:$0xff] (!%p568_p10)  ;;  %v2939_v17 = vpack.c.bf16 (!%p568_p10), %v851_v14, %v850_v12  ;;  %v4365_v62 = vshrl.u32 (!%p568_p10), %v573_v48, 7 }
 0x15d   : > { %v2937_v9 = vpack.c.bf16 (!%p568_p10), %v833_v7, %v832_v6  ;;  %v864_v10 = vld [vmem:[%s4301_s11 + $0x100] sm:$0xff] (!%p568_p10)  ;;  %v865_v11 = vld [vmem:[%s4301_s11 + $0x108] sm:$0xff] (!%p568_p10)  ;;  %2936 = vmatprep.subr.bf16.mxu0 (!%p568_p10), %v2935_v4  ;;  %v883_v16 = vld [vmem:[%s4301_s11 + $0x198] sm:$0xff] (!%p568_p10) }
 0x15e   : > { %v2969_v13 = vpack.c.bf16 (!%p568_p10), %v865_v11, %v864_v10  ;;  %2968 = vmatprep.subr.bf16.mxu1 (!%p568_p10), %v2967_v8  ;;  %v2971_v18 = vpack.c.bf16 (!%p568_p10), %v883_v16, %v882_v15  ;;  %v834_v19 = vld [vmem:[%s4301_s11 + $0x10] sm:$0xff] (!%p568_p10)  ;;  %v835_v20 = vld [vmem:[%s4301_s11 + $0x18] sm:$0xff] (!%p568_p10)  ;;  %v852_v24 = vld [vmem:[%s4301_s11 + $0xa0] sm:$0xff] (!%p568_p10)  ;;  %v589_v2 = vadd.s32 (!%p568_p10), 120, %v4365_v62  ;;  %v622_v14 = vsub.s32 (!%p568_p10), 3, %v4365_v62 }
 0x15f   : > { %2938 = vmatpush3.bf16.msra.mxu0 (!%p568_p10), %v2937_v9  ;;  %v866_v21 = vld [vmem:[%s4301_s11 + $0x110] sm:$0xff] (!%p568_p10)  ;;  %v2941_v22 = vpack.c.bf16 (!%p568_p10), %v835_v20, %v834_v19  ;;  %v867_v23 = vld [vmem:[%s4301_s11 + $0x118] sm:$0xff] (!%p568_p10)  ;;  %v853_v25 = vld [vmem:[%s4301_s11 + $0xa8] sm:$0xff] (!%p568_p10) }
 0x160   : > { %2970 = vmatpush3.bf16.msra.mxu1 (!%p568_p10), %v2969_v13  ;;  %2940 = vmatprep.subr.bf16.mxu0 (!%p568_p10), %v2939_v17  ;;  %v2973_v26 = vpack.c.bf16 (!%p568_p10), %v867_v23, %v866_v21  ;;  %v2943_v27 = vpack.c.bf16 (!%p568_p10), %v853_v25, %v852_v24  ;;  %v884_v28 = vld [vmem:[%s4301_s11 + $0x1a0] sm:$0xff] (!%p568_p10)  ;;  %v885_v29 = vld [vmem:[%s4301_s11 + $0x1a8] sm:$0xff] (!%p568_p10)  ;;  %v854_v36 = vld [vmem:[%s4301_s11 + $0xb0] sm:$0xff] (!%p568_p10)  ;;  %s2351_s12 = sshll.u32 (!%p568_p10), %s5164_s23, 7  ;;  %v614_v13 = vsub.s32 (!%p568_p10), 1, %v4365_v62 }
 0x161   : > { %2972 = vmatprep.subr.bf16.mxu1 (!%p568_p10), %v2971_v18  ;;  %v836_v30 = vld [vmem:[%s4301_s11 + $0x20] sm:$0xff] (!%p568_p10)  ;;  %v2975_v31 = vpack.c.bf16 (!%p568_p10), %v885_v29, %v884_v28  ;;  %v837_v32 = vld [vmem:[%s4301_s11 + $0x28] sm:$0xff] (!%p568_p10)  ;;  %v855_v37 = vld [vmem:[%s4301_s11 + $0xb8] sm:$0xff] (!%p568_p10)  ;;  %v4373_v8 = vstv (!%p568_p10), %s2351_s12 }
 0x162   : > { %v868_v33 = vld [vmem:[%s4301_s11 + $0x120] sm:$0xff]  ;;  %v869_v34 = vld [vmem:[%s4301_s11 + $0x128] sm:$0xff]  ;;  %v2945_v35 = vpack.c.bf16 %v837_v32, %v836_v30  ;;  %v886_v38 = vld [vmem:[%s4301_s11 + $0x1b0] sm:$0xff]  ;;  %v2947_v40 = vpack.c.bf16 %v855_v37, %v854_v36  ;;  %v4381_v15 = vadd.s32 %v4373_v8, %v589_v2  ;;  %v591_v20 = vadd.s32 %v4373_v8, %v4365_v62 }
 0x163   : > { %2942 = vmatpush3.bf16.msra.mxu0 %v2941_v22  ;;  %v2977_v39 = vpack.c.bf16 %v869_v34, %v868_v33  ;;  %v887_v41 = vld [vmem:[%s4301_s11 + $0x1b8] sm:$0xff]  ;;  %v838_v42 = vld [vmem:[%s4301_s11 + $0x30] sm:$0xff]  ;;  %v856_v47 = vld [vmem:[%s4301_s11 + $0xc0] sm:$0xff]  ;;  %v583_v2 = vadd.s32 72, %v4365_v62 }
 0x164   : > { %2974 = vmatpush3.bf16.msra.mxu1 %v2973_v26  ;;  %2944 = vmatprep.subr.bf16.mxu0 %v2943_v27  ;;  %v839_v43 = vld [vmem:[%s4301_s11 + $0x38] sm:$0xff]  ;;  %v2979_v44 = vpack.c.bf16 %v887_v41, %v886_v38  ;;  %v870_v45 = vld [vmem:[%s4301_s11 + $0x130] sm:$0xff]  ;;  %v857_v49 = vld [vmem:[%s4301_s11 + $0xc8] sm:$0xff]  ;;  %v575_v41 = vadd.s32 8, %v4365_v62 }
 0x165   : > { %2976 = vmatprep.subr.bf16.mxu1 %v2975_v31  ;;  %v871_v46 = vld [vmem:[%s4301_s11 + $0x138] sm:$0xff]  ;;  %v888_v50 = vld [vmem:[%s4301_s11 + $0x1c0] sm:$0xff]  ;;  %v889_v51 = vld [vmem:[%s4301_s11 + $0x1c8] sm:$0xff]  ;;  %v2949_v52 = vpack.c.bf16 %v839_v43, %v838_v42  ;;  %v2951_v54 = vpack.c.bf16 %v857_v49, %v856_v47 }
 0x166   : > { %v2981_v53 = vpack.c.bf16 %v871_v46, %v870_v45  ;;  %v840_v55 = vld [vmem:[%s4301_s11 + $0x40] sm:$0xff]  ;;  %v841_v56 = vld [vmem:[%s4301_s11 + $0x48] sm:$0xff]  ;;  %v2983_v58 = vpack.c.bf16 %v889_v51, %v888_v50  ;;  %v858_v60 = vld [vmem:[%s4301_s11 + $0xd0] sm:$0xff]  ;;  %v3780_v45 = vmov 1.0   ;;  %v592_v50 = vadd.s32 %v4373_v8, %v575_v41 }
 0x167   : > { %2946 = vmatpush3.bf16.msra.mxu0 %v2945_v35  ;;  %v872_v57 = vld [vmem:[%s4301_s11 + $0x140] sm:$0xff]  ;;  %v873_v59 = vld [vmem:[%s4301_s11 + $0x148] sm:$0xff]  ;;  %v859_v61 = vld [vmem:[%s4301_s11 + $0xd8] sm:$0xff]  ;;  %v2953_v1 = vpack.c.bf16 %v841_v56, %v840_v55  ;;  %v610_v35 = vsub.s32 0, %v4365_v62  ;;  %v576_v51 = vadd.s32 16, %v4365_v62  ;;  %v578_v55 = vadd.s32 32, %v4365_v62 }
 0x168   : > { %2978 = vmatpush3.bf16.msra.mxu1 %v2977_v39  ;;  %2948 = vmatprep.subr.bf16.mxu0 %v2947_v40  ;;  %v890_v63 = vld [vmem:[%s4301_s11 + $0x1d0] sm:$0xff]  ;;  %v891_v0 = vld [vmem:[%s4301_s11 + $0x1d8] sm:$0xff]  ;;  %v2985_v3 = vpack.c.bf16 %v873_v59, %v872_v57  ;;  %v2955_v4 = vpack.c.bf16 %v859_v61, %v858_v60  ;;  %v860_v11 = vld [vmem:[%s4301_s11 + $0xe0] sm:$0xff]  ;;  %v618_v40 = vsub.s32 2, %v4365_v62  ;;  %v579_v57 = vadd.s32 40, %v4365_v62 }
 0x169   : > { %2980 = vmatprep.subr.bf16.mxu1 %v2979_v44  ;;  %v842_v5 = vld [vmem:[%s4301_s11 + $0x50] sm:$0xff]  ;;  %v843_v6 = vld [vmem:[%s4301_s11 + $0x58] sm:$0xff]  ;;  %v2987_v9 = vpack.c.bf16 %v891_v0, %v890_v63  ;;  %v861_v12 = vld [vmem:[%s4301_s11 + $0xe8] sm:$0xff]  ;;  %v595_v56 = vadd.s32 %v4373_v8, %v578_v55  ;;  %v580_v59 = vadd.s32 48, %v4365_v62  ;;  %v581_v61 = vadd.s32 56, %v4365_v62 }
 0x16a   : > { %v874_v7 = vld [vmem:[%s4301_s11 + $0x150] sm:$0xff]  ;;  %v875_v10 = vld [vmem:[%s4301_s11 + $0x158] sm:$0xff]  ;;  %v892_v16 = vld [vmem:[%s4301_s11 + $0x1e0] sm:$0xff]  ;;  %v2957_v18 = vpack.c.bf16 %v843_v6, %v842_v5  ;;  %v2959_v22 = vpack.c.bf16 %v861_v12, %v860_v11  ;;  %v582_v0 = vadd.s32 64, %v4365_v62  ;;  %v585_v6 = vadd.s32 88, %v4365_v62 }
 0x16b   : > { %2950 = vmatpush3.bf16.msra.mxu0 %v2949_v52  ;;  %v893_v17 = vld [vmem:[%s4301_s11 + $0x1e8] sm:$0xff]  ;;  %v844_v19 = vld [vmem:[%s4301_s11 + $0x60] sm:$0xff]  ;;  %v2989_v21 = vpack.c.bf16 %v875_v10, %v874_v7  ;;  %v607_v25 = vld [vmem:[%s459_s0] sm:$0xf]  ;;  %v593_v52 = vadd.s32 %v4373_v8, %v576_v51  ;;  %v597_v60 = vadd.s32 %v4373_v8, %v580_v59  ;;  %v598_v63 = vadd.s32 %v4373_v8, %v581_v61 }
 0x16c   : > { %2982 = vmatpush3.bf16.msra.mxu1 %v2981_v53  ;;  %2952 = vmatprep.subr.bf16.mxu0 %v2951_v54  ;;  %v845_v23 = vld [vmem:[%s4301_s11 + $0x68] sm:$0xff]  ;;  %v876_v24 = vld [vmem:[%s4301_s11 + $0x160] sm:$0xff]  ;;  %v2991_v26 = vpack.c.bf16 %v893_v17, %v892_v16  ;;  %v862_v28 = vld [vmem:[%s4301_s11 + $0xf0] sm:$0xff]  ;;  %v4395_v30 = vrot.slane %v607_v25, %v614_v13  ;;  %v4397_v31 = vrot.slane %v607_v25, %v622_v14  ;;  %v577_v53 = vadd.s32 24, %v4365_v62 }
 0x16d   : > { %2984 = vmatprep.subr.bf16.mxu1 %v2983_v58  ;;  %v877_v27 = vld [vmem:[%s4301_s11 + $0x168] sm:$0xff]  ;;  %v863_v29 = vld [vmem:[%s4301_s11 + $0xf8] sm:$0xff]  ;;  %v894_v32 = vld [vmem:[%s4301_s11 + $0x1f0] sm:$0xff]  ;;  %v2961_v34 = vpack.c.bf16 %v845_v23, %v844_v19  ;;  %v4416_v47 = vrot.slane %v607_v25, %v610_v35  ;;  %v4418_v49 = vrot.slane %v607_v25, %v618_v40  ;;  %v596_v58 = vadd.s32 %v4373_v8, %v579_v57 }
 0x16e   : > { %v895_v33 = vld [vmem:[%s4301_s11 + $0x1f8] sm:$0xff]  ;;  %vm625_vm0 = vcmp.eq.s32.totalorder %v591_v20, %v4395_v30  ;;  %vm627_vm1 = vcmp.eq.s32.totalorder %v591_v20, %v4397_v31  ;;  %v2993_v36 = vpack.c.bf16 %v877_v27, %v876_v24  ;;  %v2963_v37 = vpack.c.bf16 %v863_v29, %v862_v28  ;;  %v846_v38 = vld [vmem:[%s4301_s11 + $0x70] sm:$0xff] }
 0x16f   : > { %2954 = vmatpush3.bf16.msra.mxu0 %v2953_v1  ;;  %v847_v39 = vld [vmem:[%s4301_s11 + $0x78] sm:$0xff]  ;;  %v2995_v42 = vpack.c.bf16 %v895_v33, %v894_v32  ;;  %v878_v43 = vld [vmem:[%s4301_s11 + $0x170] sm:$0xff]  ;;  %2416 = vmatprep.mubr.msk.f32.mxu0 %vm625_vm0, %v3780_v45  ;;  %vm624_vm2 = vcmp.eq.s32.totalorder %v591_v20, %v4416_v47  ;;  %vm626_vm3 = vcmp.eq.s32.totalorder %v591_v20, %v4418_v49  ;;  %v587_v11 = vadd.s32 104, %v4365_v62 }
 0x170   : > { %2986 = vmatpush3.bf16.msra.mxu1 %v2985_v3  ;;  %2956 = vmatprep.subr.bf16.mxu0 %v2955_v4  ;;  %v879_v44 = vld [vmem:[%s4301_s11 + $0x178] sm:$0xff]  ;;  %v2965_v46 = vpack.c.bf16 %v847_v39, %v846_v38  ;;  %vm629_vm4 = vcmp.eq.s32.totalorder %v592_v50, %v4395_v30  ;;  %vm631_vm5 = vcmp.eq.s32.totalorder %v592_v50, %v4397_v31  ;;  %v584_v4 = vadd.s32 80, %v4365_v62 }
 0x171   : > { %2988 = vmatprep.subr.bf16.mxu1 %v2987_v9  ;;  %2448 = vmatprep.mubr.msk.f32.mxu1 %vm627_vm1, %v3780_v45  ;;  %v2997_v48 = vpack.c.bf16 %v879_v44, %v878_v43  ;;  %vm628_vm6 = vcmp.eq.s32.totalorder %v592_v50, %v4416_v47  ;;  %vm630_vm7 = vcmp.eq.s32.totalorder %v592_v50, %v4418_v49  ;;  %v586_v9 = vadd.s32 96, %v4365_v62  ;;  %v816_v20 = vld [vmem:[#allocation2] sm:$0xff] }
 0x172   : > { %vm633_vm8 = vcmp.eq.s32.totalorder %v593_v52, %v4395_v30  ;;  %v594_v54 = vadd.s32 %v4373_v8, %v577_v53  ;;  %vm635_vm9 = vcmp.eq.s32.totalorder %v593_v52, %v4397_v31  ;;  %vm632_vm10 = vcmp.eq.s32.totalorder %v593_v52, %v4416_v47  ;;  %v820_v55 = vld [vmem:[#allocation2 + $0x20] sm:$0xff] }
 0x173   : > { %2958 = vmatpush3.bf16.msra.mxu0 %v2957_v18  ;;  %vm685_vm11 = vcmp.eq.s32.totalorder %v4381_v15, %v4395_v30  ;;  %vm687_vm12 = vcmp.eq.s32.totalorder %v4381_v15, %v4397_v31  ;;  %vm634_vm13 = vcmp.eq.s32.totalorder %v593_v52, %v4418_v49  ;;  %v599_v1 = vadd.s32 %v4373_v8, %v582_v0 }
 0x174   : > { %2990 = vmatpush3.bf16.msra.mxu1 %v2989_v21  ;;  %2960 = vmatprep.subr.bf16.mxu0 %v2959_v22  ;;  %vm637_vm14 = vcmp.eq.s32.totalorder %v594_v54, %v4395_v30  ;;  %vm639_vm15 = vcmp.eq.s32.totalorder %v594_v54, %v4397_v31  ;;  %vm636_vm0 = vcmp.eq.s32.totalorder %v594_v54, %v4416_v47  ;;  %v588_v13 = vadd.s32 112, %v4365_v62 }
 0x175   : > { %2992 = vmatprep.subr.bf16.mxu1 %v2991_v26  ;;  %vm638_vm1 = vcmp.eq.s32.totalorder %v594_v54, %v4418_v49  ;;  %v600_v3 = vadd.s32 %v4373_v8, %v583_v2  ;;  %v601_v5 = vadd.s32 %v4373_v8, %v584_v4  ;;  %v602_v7 = vadd.s32 %v4373_v8, %v585_v6 }
 0x176   : > { %v603_v10 = vadd.s32 %v4373_v8, %v586_v9  ;;  %v604_v12 = vadd.s32 %v4373_v8, %v587_v11  ;;  %v605_v14 = vadd.s32 %v4373_v8, %v588_v13  ;;  %v822_v11 = vld [vmem:[#allocation2 + $0x30] sm:$0xff] }
 0x177   : > { %2962 = vmatpush3.bf16.msra.mxu0 %v2961_v34 }
 0x178   : > { %2994 = vmatpush3.bf16.msra.mxu1 %v2993_v36  ;;  %2964 = vmatprep.subr.bf16.mxu0 %v2963_v37  ;;  %v818_v37 = vld [vmem:[#allocation2 + $0x10] sm:$0xff] }
 0x179   : > { %2996 = vmatprep.subr.bf16.mxu1 %v2995_v42 }
 0x17b   : > { %2966 = vmatpush3.bf16.msra.mxu0 %v2965_v46  ;;  %v819_v46 = vld [vmem:[#allocation2 + $0x18] sm:$0xff] }
 0x17c   : > { %2998 = vmatpush3.bf16.msra.mxu1 %v2997_v48 }
 0x17e   : > { %2417 = vmatmul.mubr.msk.f32.vlgmr.msra.gmra.mrb[0].mxu0 %vm624_vm2, %v3780_v45  ;;  %vm641_vm2 = vcmp.eq.s32.totalorder %v595_v56, %v4395_v30 }
 0x17f   : > { %2449 = vmatmul.mubr.msk.f32.vlgmr.msra.gmra.mrb[0].mxu1 %vm626_vm3, %v3780_v45  ;;  %2418 = vmatprep.mubr.msk.f32.mxu0 %vm629_vm4, %v3780_v45  ;;  %vm643_vm3 = vcmp.eq.s32.totalorder %v595_v56, %v4397_v31  ;;  %vm640_vm4 = vcmp.eq.s32.totalorder %v595_v56, %v4416_v47 }
 0x180   : > { %2450 = vmatprep.mubr.msk.f32.mxu1 %vm631_vm5, %v3780_v45  ;;  %vm642_vm5 = vcmp.eq.s32.totalorder %v595_v56, %v4418_v49 }
 0x182   : > { %2419 = vmatmul.mubr.msk.f32.gmra.mrb[2].mxu0 %vm628_vm6, %v3780_v45  ;;  %vm645_vm6 = vcmp.eq.s32.totalorder %v596_v58, %v4395_v30 }
 0x183   : > { %2451 = vmatmul.mubr.msk.f32.gmra.mrb[2].mxu1 %vm630_vm7, %v3780_v45  ;;  %2420 = vmatprep.mubr.msk.f32.mxu0 %vm633_vm8, %v3780_v45  ;;  %vm647_vm7 = vcmp.eq.s32.totalorder %v596_v58, %v4397_v31  ;;  %vm644_vm8 = vcmp.eq.s32.totalorder %v596_v58, %v4416_v47 }
 0x184   : > { %2452 = vmatprep.mubr.msk.f32.mxu1 %vm635_vm9, %v3780_v45  ;;  %vm646_vm9 = vcmp.eq.s32.totalorder %v596_v58, %v4418_v49 }
 0x186   : > { %2421 = vmatmul.mubr.msk.f32.gmra.mrb[4].mxu0 %vm632_vm10, %v3780_v45  ;;  %vm649_vm10 = vcmp.eq.s32.totalorder %v597_v60, %v4395_v30 }
 0x187   : > { %2453 = vmatmul.mubr.msk.f32.gmra.mrb[4].mxu1 %vm634_vm13, %v3780_v45  ;;  %2422 = vmatprep.mubr.msk.f32.mxu0 %vm637_vm14, %v3780_v45  ;;  %vm651_vm13 = vcmp.eq.s32.totalorder %v597_v60, %v4397_v31  ;;  %vm648_vm14 = vcmp.eq.s32.totalorder %v597_v60, %v4416_v47 }
 0x188   : > { %2454 = vmatprep.mubr.msk.f32.mxu1 %vm639_vm15, %v3780_v45  ;;  %vm650_vm15 = vcmp.eq.s32.totalorder %v597_v60, %v4418_v49 }
 0x18a   : > { %2423 = vmatmul.mubr.msk.f32.gmra.mrb[6].mxu0 %vm636_vm0, %v3780_v45  ;;  %vm653_vm0 = vcmp.eq.s32.totalorder %v598_v63, %v4395_v30 }
 0x18b   : > { %2455 = vmatmul.mubr.msk.f32.gmra.mrb[6].mxu1 %vm638_vm1, %v3780_v45  ;;  %2424 = vmatprep.mubr.msk.f32.mxu0 %vm641_vm2, %v3780_v45  ;;  %vm655_vm1 = vcmp.eq.s32.totalorder %v598_v63, %v4397_v31  ;;  %vm652_vm2 = vcmp.eq.s32.totalorder %v598_v63, %v4416_v47 }
 0x18c   : > { %2456 = vmatprep.mubr.msk.f32.mxu1 %vm643_vm3, %v3780_v45  ;;  %vm654_vm3 = vcmp.eq.s32.totalorder %v598_v63, %v4418_v49 }
 0x18e   : > { %2425 = vmatmul.mubr.msk.f32.gmra.mrb[8].mxu0 %vm640_vm4, %v3780_v45  ;;  %vm657_vm4 = vcmp.eq.s32.totalorder %v599_v1, %v4395_v30 }
 0x18f   : > { %2457 = vmatmul.mubr.msk.f32.gmra.mrb[8].mxu1 %vm642_vm5, %v3780_v45  ;;  %2426 = vmatprep.mubr.msk.f32.mxu0 %vm645_vm6, %v3780_v45  ;;  %vm659_vm5 = vcmp.eq.s32.totalorder %v599_v1, %v4397_v31  ;;  %vm656_vm6 = vcmp.eq.s32.totalorder %v599_v1, %v4416_v47 }
 0x190   : > { %2458 = vmatprep.mubr.msk.f32.mxu1 %vm647_vm7, %v3780_v45  ;;  %vm658_vm7 = vcmp.eq.s32.totalorder %v599_v1, %v4418_v49  ;;  %v821_v1 = vld [vmem:[#allocation2 + $0x28] sm:$0xff] }
 0x192   : > { %2427 = vmatmul.mubr.msk.f32.gmra.mrb[10].mxu0 %vm644_vm8, %v3780_v45  ;;  %vm661_vm8 = vcmp.eq.s32.totalorder %v600_v3, %v4395_v30 }
 0x193   : > { %2459 = vmatmul.mubr.msk.f32.gmra.mrb[10].mxu1 %vm646_vm9, %v3780_v45  ;;  %2428 = vmatprep.mubr.msk.f32.mxu0 %vm649_vm10, %v3780_v45  ;;  %vm663_vm9 = vcmp.eq.s32.totalorder %v600_v3, %v4397_v31  ;;  %vm660_vm10 = vcmp.eq.s32.totalorder %v600_v3, %v4416_v47 }
 0x194   : > { %2460 = vmatprep.mubr.msk.f32.mxu1 %vm651_vm13, %v3780_v45  ;;  %vm662_vm13 = vcmp.eq.s32.totalorder %v600_v3, %v4418_v49 }
 0x196   : > { %2429 = vmatmul.mubr.msk.f32.gmra.mrb[12].mxu0 %vm648_vm14, %v3780_v45  ;;  %vm665_vm14 = vcmp.eq.s32.totalorder %v601_v5, %v4395_v30 }
 0x197   : > { %2461 = vmatmul.mubr.msk.f32.gmra.mrb[12].mxu1 %vm650_vm15, %v3780_v45  ;;  %2430 = vmatprep.mubr.msk.f32.mxu0 %vm653_vm0, %v3780_v45  ;;  %vm667_vm15 = vcmp.eq.s32.totalorder %v601_v5, %v4397_v31  ;;  %vm664_vm0 = vcmp.eq.s32.totalorder %v601_v5, %v4416_v47 }
 0x198   : > { %2462 = vmatprep.mubr.msk.f32.mxu1 %vm655_vm1, %v3780_v45  ;;  %vm666_vm1 = vcmp.eq.s32.totalorder %v601_v5, %v4418_v49 }
 0x19a   : > { %2431 = vmatmul.mubr.msk.f32.gmra.mrb[14].mxu0 %vm652_vm2, %v3780_v45  ;;  %vm669_vm2 = vcmp.eq.s32.totalorder %v602_v7, %v4395_v30 }
 0x19b   : > { %2463 = vmatmul.mubr.msk.f32.gmra.mrb[14].mxu1 %vm654_vm3, %v3780_v45  ;;  %2432 = vmatprep.mubr.msk.f32.mxu0 %vm657_vm4, %v3780_v45  ;;  %vm671_vm3 = vcmp.eq.s32.totalorder %v602_v7, %v4397_v31  ;;  %vm668_vm4 = vcmp.eq.s32.totalorder %v602_v7, %v4416_v47 }
 0x19c   : > { %2464 = vmatprep.mubr.msk.f32.mxu1 %vm659_vm5, %v3780_v45  ;;  %vm670_vm5 = vcmp.eq.s32.totalorder %v602_v7, %v4418_v49 }
 0x19e   : > { %2433 = vmatmul.mubr.msk.f32.gmra.mrb[16].mxu0 %vm656_vm6, %v3780_v45  ;;  %vm673_vm6 = vcmp.eq.s32.totalorder %v603_v10, %v4395_v30 }
 0x19f   : > { %2465 = vmatmul.mubr.msk.f32.gmra.mrb[16].mxu1 %vm658_vm7, %v3780_v45  ;;  %2434 = vmatprep.mubr.msk.f32.mxu0 %vm661_vm8, %v3780_v45  ;;  %vm675_vm7 = vcmp.eq.s32.totalorder %v603_v10, %v4397_v31  ;;  %vm672_vm8 = vcmp.eq.s32.totalorder %v603_v10, %v4416_v47 }
 0x1a0   : > { %2466 = vmatprep.mubr.msk.f32.mxu1 %vm663_vm9, %v3780_v45  ;;  %vm674_vm9 = vcmp.eq.s32.totalorder %v603_v10, %v4418_v49 }
 0x1a2   : > { %2435 = vmatmul.mubr.msk.f32.gmra.mrb[18].mxu0 %vm660_vm10, %v3780_v45  ;;  %vm677_vm10 = vcmp.eq.s32.totalorder %v604_v12, %v4395_v30 }
 0x1a3   : > { %2467 = vmatmul.mubr.msk.f32.gmra.mrb[18].mxu1 %vm662_vm13, %v3780_v45  ;;  %2436 = vmatprep.mubr.msk.f32.mxu0 %vm665_vm14, %v3780_v45  ;;  %vm679_vm13 = vcmp.eq.s32.totalorder %v604_v12, %v4397_v31  ;;  %vm676_vm14 = vcmp.eq.s32.totalorder %v604_v12, %v4416_v47 }
 0x1a4   : > { %2468 = vmatprep.mubr.msk.f32.mxu1 %vm667_vm15, %v3780_v45  ;;  %vm678_vm15 = vcmp.eq.s32.totalorder %v604_v12, %v4418_v49 }
 0x1a6   : > { %2437 = vmatmul.mubr.msk.f32.gmra.mrb[20].mxu0 %vm664_vm0, %v3780_v45  ;;  %vm681_vm0 = vcmp.eq.s32.totalorder %v605_v14, %v4395_v30 }
 0x1a7   : > { %2469 = vmatmul.mubr.msk.f32.gmra.mrb[20].mxu1 %vm666_vm1, %v3780_v45  ;;  %2438 = vmatprep.mubr.msk.f32.mxu0 %vm669_vm2, %v3780_v45  ;;  %vm683_vm1 = vcmp.eq.s32.totalorder %v605_v14, %v4397_v31  ;;  %vm680_vm2 = vcmp.eq.s32.totalorder %v605_v14, %v4416_v47 }
 0x1a8   : > { %2470 = vmatprep.mubr.msk.f32.mxu1 %vm671_vm3, %v3780_v45  ;;  %vm682_vm3 = vcmp.eq.s32.totalorder %v605_v14, %v4418_v49 }
 0x1aa   : > { %2439 = vmatmul.mubr.msk.f32.gmra.mrb[22].mxu0 %vm668_vm4, %v3780_v45  ;;  %vm684_vm4 = vcmp.eq.s32.totalorder %v4381_v15, %v4416_v47 }
 0x1ab   : > { %2471 = vmatmul.mubr.msk.f32.gmra.mrb[22].mxu1 %vm670_vm5, %v3780_v45  ;;  %2440 = vmatprep.mubr.msk.f32.mxu0 %vm673_vm6, %v3780_v45  ;;  %vm686_vm5 = vcmp.eq.s32.totalorder %v4381_v15, %v4418_v49  ;;  %v817_v15 = vld [vmem:[#allocation2 + $0x8] sm:$0xff] }
 0x1ac   : > { %2472 = vmatprep.mubr.msk.f32.mxu1 %vm675_vm7, %v3780_v45 }
 0x1ae   : > { %2441 = vmatmul.mubr.msk.f32.gmra.mrb[24].mxu0 %vm672_vm8, %v3780_v45 }
 0x1af   : > { %2473 = vmatmul.mubr.msk.f32.gmra.mrb[24].mxu1 %vm674_vm9, %v3780_v45  ;;  %2442 = vmatprep.mubr.msk.f32.mxu0 %vm677_vm10, %v3780_v45 }
 0x1b0   : > { %2474 = vmatprep.mubr.msk.f32.mxu1 %vm679_vm13, %v3780_v45 }
 0x1b2   : > { %2443 = vmatmul.mubr.msk.f32.gmra.mrb[26].mxu0 %vm676_vm14, %v3780_v45 }
 0x1b3   : > { %2475 = vmatmul.mubr.msk.f32.gmra.mrb[26].mxu1 %vm678_vm15, %v3780_v45  ;;  %2444 = vmatprep.mubr.msk.f32.mxu0 %vm681_vm0, %v3780_v45 }
 0x1b4   : > { %2476 = vmatprep.mubr.msk.f32.mxu1 %vm683_vm1, %v3780_v45 }
 0x1b6   : > { %2445 = vmatmul.mubr.msk.f32.gmra.mrb[28].mxu0 %vm680_vm2, %v3780_v45 }
 0x1b7   : > { %2477 = vmatmul.mubr.msk.f32.gmra.mrb[28].mxu1 %vm682_vm3, %v3780_v45  ;;  %2446 = vmatprep.mubr.msk.f32.mxu0 %vm685_vm11, %v3780_v45 }
 0x1b8   : > { %2478 = vmatprep.mubr.msk.f32.mxu1 %vm687_vm12, %v3780_v45 }
 0x1ba   : > { %2447 = vmatmul.mubr.msk.f32.gmra.mrb[30].mxu0 %vm684_vm4, %v3780_v45 }
 0x1bb   : > { %2479 = vmatmul.mubr.msk.f32.gmra.mrb[30].mxu1 %vm686_vm5, %v3780_v45 }
 0x251   : > { %v2543_v62 = vpop.f32.mrb[0].mxu0 }
 0x252   : > { %v2623_v8 = vpop.f32.mrb[0].mxu1  ;;  %v2544_v16 = vpop.f32.mrb[1].mxu0 }
 0x253   : > { %v2545_v17 = vadd.f32 %v2544_v16, %v2543_v62  ;;  %v2624_v18 = vpop.f32.mrb[1].mxu1 }
 0x254   : > { %v2625_v19 = vadd.f32 %v2624_v18, %v2623_v8 }
 0x255   : > { %v2546_v21 = vpop.f32.mrb[2].mxu0 }
 0x256   : > { %v1108_v22 = vadd.f32 %v2625_v19, %v2545_v17  ;;  %v2626_v23 = vpop.f32.mrb[2].mxu1  ;;  %v2547_v24 = vpop.f32.mrb[3].mxu0  ;;  %v823_v19 = vld [vmem:[#allocation2 + $0x38] sm:$0xff] }
 0x257   : > { %v2548_v25 = vadd.f32 %v2547_v24, %v2546_v21  ;;  %v2627_v26 = vpop.f32.mrb[3].mxu1 }
 0x258   : > { %v1186_v27 = vadd.f32 %v1108_v22, %v816_v20  ;;  %v2628_v28 = vadd.f32 %v2627_v26, %v2626_v23 }
 0x259   : > { %v2549_v29 = vpop.f32.mrb[4].mxu0 }
 0x25a   : > { %1202 = vst [vmem:[#allocation2] sm:$0xff] %v1186_v27  ;;  %v1113_v30 = vadd.f32 %v2628_v28, %v2548_v25  ;;  %v2629_v31 = vpop.f32.mrb[4].mxu1  ;;  %v2550_v32 = vpop.f32.mrb[5].mxu0  ;;  %v824_v28 = vld [vmem:[#allocation2 + $0x40] sm:$0xff] }
 0x25b   : > { %v2551_v33 = vadd.f32 %v2550_v32, %v2549_v29  ;;  %v2630_v34 = vpop.f32.mrb[5].mxu1 }
 0x25c   : > { %v1187_v35 = vadd.f32 %v1113_v30, %v817_v15  ;;  %v2631_v36 = vadd.f32 %v2630_v34, %v2629_v31 }
 0x25d   : > { %v2552_v38 = vpop.f32.mrb[6].mxu0 }
 0x25e   : > { %1203 = vst [vmem:[#allocation2 + $0x8] sm:$0xff] %v1187_v35  ;;  %v1118_v39 = vadd.f32 %v2631_v36, %v2551_v33  ;;  %v2632_v40 = vpop.f32.mrb[6].mxu1  ;;  %v2553_v41 = vpop.f32.mrb[7].mxu0  ;;  %v825_v36 = vld [vmem:[#allocation2 + $0x48] sm:$0xff] }
 0x25f   : > { %v2554_v42 = vadd.f32 %v2553_v41, %v2552_v38  ;;  %v2633_v43 = vpop.f32.mrb[7].mxu1 }
 0x260   : > { %v1188_v44 = vadd.f32 %v1118_v39, %v818_v37  ;;  %v2634_v45 = vadd.f32 %v2633_v43, %v2632_v40 }
 0x261   : > { %v2555_v47 = vpop.f32.mrb[8].mxu0 }
 0x262   : > { %1204 = vst [vmem:[#allocation2 + $0x10] sm:$0xff] %v1188_v44  ;;  %v1123_v48 = vadd.f32 %v2634_v45, %v2554_v42  ;;  %v2635_v49 = vpop.f32.mrb[8].mxu1  ;;  %v2556_v50 = vpop.f32.mrb[9].mxu0  ;;  %v826_v45 = vld [vmem:[#allocation2 + $0x50] sm:$0xff] }
 0x263   : > { %v2557_v51 = vadd.f32 %v2556_v50, %v2555_v47  ;;  %v2636_v52 = vpop.f32.mrb[9].mxu1 }
 0x264   : > { %v1189_v53 = vadd.f32 %v1123_v48, %v819_v46  ;;  %v2637_v54 = vadd.f32 %v2636_v52, %v2635_v49 }
 0x265   : > { %v2558_v56 = vpop.f32.mrb[10].mxu0 }
 0x266   : > { %1205 = vst [vmem:[#allocation2 + $0x18] sm:$0xff] %v1189_v53  ;;  %v1128_v57 = vadd.f32 %v2637_v54, %v2557_v51  ;;  %v2638_v58 = vpop.f32.mrb[10].mxu1  ;;  %v2559_v59 = vpop.f32.mrb[11].mxu0  ;;  %v827_v54 = vld [vmem:[#allocation2 + $0x58] sm:$0xff] }
 0x267   : > { %v2560_v60 = vadd.f32 %v2559_v59, %v2558_v56  ;;  %v2639_v61 = vpop.f32.mrb[11].mxu1 }
 0x268   : > { %v1190_v63 = vadd.f32 %v1128_v57, %v820_v55  ;;  %v2640_v0 = vadd.f32 %v2639_v61, %v2638_v58 }
 0x269   : > { %v2561_v2 = vpop.f32.mrb[12].mxu0 }
 0x26a   : > { %1206 = vst [vmem:[#allocation2 + $0x20] sm:$0xff] %v1190_v63  ;;  %v1133_v3 = vadd.f32 %v2640_v0, %v2560_v60  ;;  %v2641_v4 = vpop.f32.mrb[12].mxu1  ;;  %v2562_v5 = vpop.f32.mrb[13].mxu0  ;;  %v828_v0 = vld [vmem:[#allocation2 + $0x60] sm:$0xff] }
 0x26b   : > { %v2563_v6 = vadd.f32 %v2562_v5, %v2561_v2  ;;  %v2642_v7 = vpop.f32.mrb[13].mxu1 }
 0x26c   : > { %v1191_v9 = vadd.f32 %v1133_v3, %v821_v1  ;;  %v2643_v10 = vadd.f32 %v2642_v7, %v2641_v4 }
 0x26d   : > { %v2564_v12 = vpop.f32.mrb[14].mxu0 }
 0x26e   : > { %1207 = vst [vmem:[#allocation2 + $0x28] sm:$0xff] %v1191_v9  ;;  %v1138_v13 = vadd.f32 %v2643_v10, %v2563_v6  ;;  %v2644_v14 = vpop.f32.mrb[14].mxu1  ;;  %v2565_v62 = vpop.f32.mrb[15].mxu0  ;;  %v829_v10 = vld [vmem:[#allocation2 + $0x68] sm:$0xff] }
 0x26f   : > { %v2566_v8 = vadd.f32 %v2565_v62, %v2564_v12  ;;  %v2645_v16 = vpop.f32.mrb[15].mxu1 }
 0x270   : > { %v1192_v17 = vadd.f32 %v1138_v13, %v822_v11  ;;  %v2646_v18 = vadd.f32 %v2645_v16, %v2644_v14 }
 0x271   : > { %v2567_v20 = vpop.f32.mrb[16].mxu0 }
 0x272   : > { %1208 = vst [vmem:[#allocation2 + $0x30] sm:$0xff] %v1192_v17  ;;  %v1143_v21 = vadd.f32 %v2646_v18, %v2566_v8  ;;  %v2647_v22 = vpop.f32.mrb[16].mxu1  ;;  %v2568_v23 = vpop.f32.mrb[17].mxu0  ;;  %v830_v18 = vld [vmem:[#allocation2 + $0x70] sm:$0xff] }
 0x273   : > { %v2569_v24 = vadd.f32 %v2568_v23, %v2567_v20  ;;  %v2648_v25 = vpop.f32.mrb[17].mxu1 }
 0x274   : > { %v1193_v26 = vadd.f32 %v1143_v21, %v823_v19  ;;  %v2649_v27 = vadd.f32 %v2648_v25, %v2647_v22 }
 0x275   : > { %v2570_v15 = vpop.f32.mrb[18].mxu0 }
 0x276   : > { %1209 = vst [vmem:[#allocation2 + $0x38] sm:$0xff] %v1193_v26  ;;  %v1148_v29 = vadd.f32 %v2649_v27, %v2569_v24  ;;  %v2650_v30 = vpop.f32.mrb[18].mxu1  ;;  %v2571_v31 = vpop.f32.mrb[19].mxu0  ;;  %v831_v27 = vld [vmem:[#allocation2 + $0x78] sm:$0xff] }
 0x277   : > { %v2572_v32 = vadd.f32 %v2571_v31, %v2570_v15  ;;  %v2651_v33 = vpop.f32.mrb[19].mxu1 }
 0x278   : > { %v1194_v34 = vadd.f32 %v1148_v29, %v824_v28  ;;  %v2652_v35 = vadd.f32 %v2651_v33, %v2650_v30 }
 0x279   : > { %v2573_v37 = vpop.f32.mrb[20].mxu0 }
 0x27a   : > { %1210 = vst [vmem:[#allocation2 + $0x40] sm:$0xff] %v1194_v34  ;;  %v1153_v38 = vadd.f32 %v2652_v35, %v2572_v32  ;;  %v2653_v39 = vpop.f32.mrb[20].mxu1  ;;  %v2574_v40 = vpop.f32.mrb[21].mxu0 }
 0x27b   : > { %v2575_v41 = vadd.f32 %v2574_v40, %v2573_v37  ;;  %v2654_v42 = vpop.f32.mrb[21].mxu1 }
 0x27c   : > { %v1195_v43 = vadd.f32 %v1153_v38, %v825_v36  ;;  %v2655_v44 = vadd.f32 %v2654_v42, %v2653_v39 }
 0x27d   : > { %v2576_v46 = vpop.f32.mrb[22].mxu0 }
 0x27e   : > { %1211 = vst [vmem:[#allocation2 + $0x48] sm:$0xff] %v1195_v43  ;;  %v1158_v47 = vadd.f32 %v2655_v44, %v2575_v41  ;;  %v2656_v48 = vpop.f32.mrb[22].mxu1  ;;  %v2577_v49 = vpop.f32.mrb[23].mxu0 }
 0x27f   : > { %v2578_v50 = vadd.f32 %v2577_v49, %v2576_v46  ;;  %v2657_v51 = vpop.f32.mrb[23].mxu1 }
 0x280   : > { %v1196_v52 = vadd.f32 %v1158_v47, %v826_v45  ;;  %v2658_v53 = vadd.f32 %v2657_v51, %v2656_v48 }
 0x281   : > { %v2579_v55 = vpop.f32.mrb[24].mxu0 }
 0x282   : > { %1212 = vst [vmem:[#allocation2 + $0x50] sm:$0xff] %v1196_v52  ;;  %v1163_v56 = vadd.f32 %v2658_v53, %v2578_v50  ;;  %v2659_v57 = vpop.f32.mrb[24].mxu1  ;;  %v2580_v58 = vpop.f32.mrb[25].mxu0 }
 0x283   : > { %v2581_v59 = vadd.f32 %v2580_v58, %v2579_v55  ;;  %v2660_v60 = vpop.f32.mrb[25].mxu1 }
 0x284   : > { %v1197_v61 = vadd.f32 %v1163_v56, %v827_v54  ;;  %v2661_v63 = vadd.f32 %v2660_v60, %v2659_v57 }
 0x285   : > { %v2582_v1 = vpop.f32.mrb[26].mxu0 }
 0x286   : > { %1213 = vst [vmem:[#allocation2 + $0x58] sm:$0xff] %v1197_v61  ;;  %v1168_v2 = vadd.f32 %v2661_v63, %v2581_v59  ;;  %v2662_v3 = vpop.f32.mrb[26].mxu1  ;;  %v2583_v4 = vpop.f32.mrb[27].mxu0 }
 0x287   : > { %v2584_v5 = vadd.f32 %v2583_v4, %v2582_v1  ;;  %v2663_v6 = vpop.f32.mrb[27].mxu1 }
 0x288   : > { %v1198_v7 = vadd.f32 %v1168_v2, %v828_v0  ;;  %v2664_v9 = vadd.f32 %v2663_v6, %v2662_v3 }
 0x289   : > { %v2585_v11 = vpop.f32.mrb[28].mxu0 }
 0x28a   : > { %1214 = vst [vmem:[#allocation2 + $0x60] sm:$0xff] %v1198_v7  ;;  %v1173_v12 = vadd.f32 %v2664_v9, %v2584_v5  ;;  %v2665_v13 = vpop.f32.mrb[28].mxu1  ;;  %v2586_v14 = vpop.f32.mrb[29].mxu0 }
 0x28b   : > { %v2587_v62 = vadd.f32 %v2586_v14, %v2585_v11  ;;  %v2666_v8 = vpop.f32.mrb[29].mxu1 }
 0x28c   : > { %v1199_v16 = vadd.f32 %v1173_v12, %v829_v10  ;;  %v2667_v17 = vadd.f32 %v2666_v8, %v2665_v13 }
 0x28d   : > { %v2588_v19 = vpop.f32.mrb[30].mxu0 }
 0x28e   : > { %1215 = vst [vmem:[#allocation2 + $0x68] sm:$0xff] %v1199_v16  ;;  %v1178_v20 = vadd.f32 %v2667_v17, %v2587_v62  ;;  %v2668_v21 = vpop.f32.mrb[30].mxu1  ;;  %v2589_v22 = vpop.f32.mrb[31].mxu0 }
 0x28f   : > { %v2590_v23 = vadd.f32 %v2589_v22, %v2588_v19  ;;  %v2669_v24 = vpop.f32.mrb[31].mxu1 }
 0x290   : > { %v1200_v25 = vadd.f32 %v1178_v20, %v830_v18  ;;  %v2670_v26 = vadd.f32 %v2669_v24, %v2668_v21 }
 0x292   : > { %1216 = vst [vmem:[#allocation2 + $0x70] sm:$0xff] %v1200_v25  ;;  %v1183_v28 = vadd.f32 %v2670_v26, %v2590_v23 }
 0x294   : > { %v1201_v15 = vadd.f32 %v1183_v28, %v831_v27 }
 0x296   : > { %1217 = vst [vmem:[#allocation2 + $0x78] sm:$0xff] %v1201_v15 }
 0x297 PF: > { %s5165_s6 = sld [smem:[#allocation33_spill]] }
 0x29d   : > { %p2480_p13 = scmp.ne.s32.totalorder %s5165_s6, 2 }
 0x29e   : > { %v1270_v29 = vld [vmem:[#allocation15] sm:$0xff] (!%p2480_p13)  ;;  %v1271_v30 = vld [vmem:[#allocation15 + $0x8] sm:$0xff] (!%p2480_p13)  ;;  %v1272_v31 = vld [vmem:[#allocation15 + $0x10] sm:$0xff] (!%p2480_p13)  ;;  %s5166_s13 = sld [smem:[#allocation44_spill]] (!%p2480_p13)  ;;  %s5167_s11 = sld [smem:[#allocation46_spill]] (!%p2480_p13) }
 0x29f   : > { %1221 = sbr.rel (%p2480_p13) target bundleno = 1544 (0x608), region = 96  ;;  %v2999_v32 = vpack.c.bf16 (!%p2480_p13), %v1271_v30, %v1270_v29  ;;  %v1273_v33 = vld [vmem:[#allocation15 + $0x18] sm:$0xff] (!%p2480_p13)  ;;  %v1274_v35 = vld [vmem:[#allocation15 + $0x20] sm:$0xff] (!%p2480_p13)  ;;  %v1275_v36 = vld [vmem:[#allocation15 + $0x28] sm:$0xff] (!%p2480_p13)  ;;  %s5168_s25 = sld [smem:[#allocation47_spill]] (!%p2480_p13) }
 0x2a0   : > { %v3003_v34 = vpack.c.bf16 (!%p2480_p13), %v1273_v33, %v1272_v31  ;;  %v3007_v37 = vpack.c.bf16 (!%p2480_p13), %v1275_v36, %v1274_v35  ;;  %v1238_v38 = vld [vmem:[#allocation2] sm:$0xff] (!%p2480_p13)  ;;  %v1276_v39 = vld [vmem:[#allocation15 + $0x30] sm:$0xff] (!%p2480_p13)  ;;  %v1278_v42 = vld [vmem:[#allocation15 + $0x40] sm:$0xff] (!%p2480_p13)  ;;  %s5169_s23 = sld [smem:[#allocation48_spill]] (!%p2480_p13) }
 0x2a1   : > { %3000 = vmatprep.subr.bf16.mxu0 (!%p2480_p13), %v2999_v32  ;;  %v1277_v40 = vld [vmem:[#allocation15 + $0x38] sm:$0xff] (!%p2480_p13)  ;;  %2799 = vmatprep.mubr.f32.mxu0 (!%p2480_p13), %v1238_v38  ;;  %v1279_v43 = vld [vmem:[#allocation15 + $0x48] sm:$0xff] (!%p2480_p13)  ;;  %v1280_v45 = vld [vmem:[#allocation15 + $0x50] sm:$0xff] (!%p2480_p13) }
 0x2a2   : > { %3002 = vmatpush3.bf16.msra.mxu0 (!%p2480_p13), %v2999_v32  ;;  %v3011_v41 = vpack.c.bf16 (!%p2480_p13), %v1277_v40, %v1276_v39  ;;  %v3015_v44 = vpack.c.bf16 (!%p2480_p13), %v1279_v43, %v1278_v42  ;;  %v1281_v46 = vld [vmem:[#allocation15 + $0x58] sm:$0xff] (!%p2480_p13)  ;;  %v1282_v48 = vld [vmem:[#allocation15 + $0x60] sm:$0xff] (!%p2480_p13)  ;;  %v1283_v49 = vld [vmem:[#allocation15 + $0x68] sm:$0xff] (!%p2480_p13) }
 0x2a3   : > { %3004 = vmatprep.subr.bf16.mxu0 (!%p2480_p13), %v3003_v34  ;;  %v3019_v47 = vpack.c.bf16 (!%p2480_p13), %v1281_v46, %v1280_v45  ;;  %v3023_v50 = vpack.c.bf16 (!%p2480_p13), %v1283_v49, %v1282_v48  ;;  %v1284_v51 = vld [vmem:[#allocation15 + $0x70] sm:$0xff] (!%p2480_p13)  ;;  %v1285_v52 = vld [vmem:[#allocation15 + $0x78] sm:$0xff] (!%p2480_p13)  ;;  %v1254_v54 = vld [vmem:[#allocation13] sm:$0xff] (!%p2480_p13) }
 0x2a4   : > { %v3027_v53 = vpack.c.bf16 (!%p2480_p13), %v1285_v52, %v1284_v51  ;;  %v1255_v55 = vld [vmem:[#allocation13 + $0x8] sm:$0xff] (!%p2480_p13)  ;;  %v1256_v57 = vld [vmem:[#allocation13 + $0x10] sm:$0xff] (!%p2480_p13)  ;;  %v1257_v58 = vld [vmem:[#allocation13 + $0x18] sm:$0xff] (!%p2480_p13) }
 0x2a5   : > { %v3031_v56 = vpack.c.bf16 (!%p2480_p13), %v1255_v55, %v1254_v54  ;;  %v1239_v59 = vld [vmem:[#allocation2 + $0x8] sm:$0xff] (!%p2480_p13)  ;;  %v1240_v60 = vld [vmem:[#allocation2 + $0x10] sm:$0xff] (!%p2480_p13)  ;;  %v3035_v61 = vpack.c.bf16 (!%p2480_p13), %v1257_v58, %v1256_v57  ;;  %v1241_v1 = vld [vmem:[#allocation2 + $0x18] sm:$0xff] (!%p2480_p13) }
 0x2a6   : > { %3006 = vmatpush3.bf16.msra.mxu0 %v3003_v34  ;;  %v1258_v63 = vld [vmem:[#allocation13 + $0x20] sm:$0xff]  ;;  %v1259_v0 = vld [vmem:[#allocation13 + $0x28] sm:$0xff]  ;;  %v1242_v2 = vld [vmem:[#allocation2 + $0x20] sm:$0xff] }
 0x2a7   : > { %3008 = vmatprep.subr.bf16.mxu0 %v3007_v37  ;;  %v3039_v3 = vpack.c.bf16 %v1259_v0, %v1258_v63  ;;  %v1260_v4 = vld [vmem:[#allocation13 + $0x30] sm:$0xff]  ;;  %v1261_v5 = vld [vmem:[#allocation13 + $0x38] sm:$0xff]  ;;  %v1243_v6 = vld [vmem:[#allocation2 + $0x28] sm:$0xff] }
 0x2a8   : > { %v1244_v7 = vld [vmem:[#allocation2 + $0x30] sm:$0xff]  ;;  %v3043_v9 = vpack.c.bf16 %v1261_v5, %v1260_v4  ;;  %v1262_v10 = vld [vmem:[#allocation13 + $0x40] sm:$0xff]  ;;  %v1245_v12 = vld [vmem:[#allocation2 + $0x38] sm:$0xff] }
 0x2a9   : > { %v1263_v11 = vld [vmem:[#allocation13 + $0x48] sm:$0xff]  ;;  %v1246_v13 = vld [vmem:[#allocation2 + $0x40] sm:$0xff]  ;;  %v1264_v62 = vld [vmem:[#allocation13 + $0x50] sm:$0xff] }
 0x2aa   : > { %3010 = vmatpush3.bf16.msra.mxu0 %v3007_v37  ;;  %v3047_v14 = vpack.c.bf16 %v1263_v11, %v1262_v10  ;;  %v1265_v8 = vld [vmem:[#allocation13 + $0x58] sm:$0xff]  ;;  %v1247_v16 = vld [vmem:[#allocation2 + $0x48] sm:$0xff]  ;;  %v1248_v17 = vld [vmem:[#allocation2 + $0x50] sm:$0xff] }
 0x2ab   : > { %3012 = vmatprep.subr.bf16.mxu0 %v3011_v41  ;;  %v3051_v18 = vpack.c.bf16 %v1265_v8, %v1264_v62  ;;  %v1266_v19 = vld [vmem:[#allocation13 + $0x60] sm:$0xff]  ;;  %v1267_v20 = vld [vmem:[#allocation13 + $0x68] sm:$0xff]  ;;  %v1249_v21 = vld [vmem:[#allocation2 + $0x58] sm:$0xff] }
 0x2ac   : > { %v1250_v22 = vld [vmem:[#allocation2 + $0x60] sm:$0xff]  ;;  %v3055_v23 = vpack.c.bf16 %v1267_v20, %v1266_v19  ;;  %v1268_v24 = vld [vmem:[#allocation13 + $0x70] sm:$0xff]  ;;  %v1251_v26 = vld [vmem:[#allocation2 + $0x68] sm:$0xff] }
 0x2ad   : > { %v1269_v25 = vld [vmem:[#allocation13 + $0x78] sm:$0xff]  ;;  %v1252_v27 = vld [vmem:[#allocation2 + $0x70] sm:$0xff]  ;;  %v1253_v15 = vld [vmem:[#allocation2 + $0x78] sm:$0xff] }
 0x2ae   : > { %3014 = vmatpush3.bf16.msra.mxu0 %v3011_v41  ;;  %v3059_v28 = vpack.c.bf16 %v1269_v25, %v1268_v24  ;;  %v4583_v29 = vld [vmem:[%s4294_s1] sm:$0xff]  ;;  %v4587_v30 = vld [vmem:[%s4294_s1 + $0x8] sm:$0xff]  ;;  %v4590_v31 = vld [vmem:[%s4294_s1 + $0x10] sm:$0xff] }
 0x2af   : > { %3016 = vmatprep.subr.bf16.mxu0 %v3015_v44  ;;  %v4595_v32 = vld [vmem:[%s4294_s1 + $0x18] sm:$0xff]  ;;  %v4598_v33 = vld [vmem:[%s4294_s1 + $0x20] sm:$0xff]  ;;  %v4603_v34 = vld [vmem:[%s4294_s1 + $0x28] sm:$0xff] }
 0x2b0   : > { %v4606_v35 = vld [vmem:[%s4294_s1 + $0x30] sm:$0xff]  ;;  %v4611_v36 = vld [vmem:[%s4294_s1 + $0x38] sm:$0xff]  ;;  %v4614_v37 = vld [vmem:[%s4294_s1 + $0x40] sm:$0xff] }
 0x2b1   : > { %v4619_v38 = vld [vmem:[%s4294_s1 + $0x48] sm:$0xff]  ;;  %v4622_v39 = vld [vmem:[%s4294_s1 + $0x50] sm:$0xff]  ;;  %v4627_v40 = vld [vmem:[%s4294_s1 + $0x58] sm:$0xff] }
 0x2b2   : > { %3018 = vmatpush3.bf16.msra.mxu0 %v3015_v44  ;;  %v1234_v41 = vld [vmem:[%s4294_s1 + $0x60] sm:$0xff]  ;;  %v4632_v42 = vld [vmem:[%s4294_s1 + $0x68] sm:$0xff]  ;;  %v1236_v43 = vld [vmem:[%s4294_s1 + $0x70] sm:$0xff] }
 0x2b3   : > { %3020 = vmatprep.subr.bf16.mxu0 %v3019_v47  ;;  %v4637_v44 = vld [vmem:[%s4294_s1 + $0x78] sm:$0xff]  ;;  %v1711_v45 = vld [vmem:[#allocation16] sm:$0xff]  ;;  %v1712_v46 = vld [vmem:[#allocation16 + $0x8] sm:$0xff] }
 0x2b4   : > { %v1713_v48 = vld [vmem:[#allocation16 + $0x10] sm:$0xff]  ;;  %v1714_v49 = vld [vmem:[#allocation16 + $0x18] sm:$0xff]  ;;  %v1715_v51 = vld [vmem:[#allocation16 + $0x20] sm:$0xff] }
 0x2b5   : > { %v1716_v52 = vld [vmem:[#allocation16 + $0x28] sm:$0xff]  ;;  %v1717_v54 = vld [vmem:[#allocation16 + $0x30] sm:$0xff]  ;;  %v1718_v55 = vld [vmem:[#allocation16 + $0x38] sm:$0xff] }
 0x2b6   : > { %3022 = vmatpush3.bf16.msra.mxu0 %v3019_v47  ;;  %v3063_v47 = vpack.c.bf16 %v1712_v46, %v1711_v45  ;;  %v1719_v57 = vld [vmem:[#allocation16 + $0x40] sm:$0xff]  ;;  %v1720_v58 = vld [vmem:[#allocation16 + $0x48] sm:$0xff]  ;;  %v1726_v4 = vld [vmem:[#allocation16 + $0x78] sm:$0xff] }
 0x2b7   : > { %3024 = vmatprep.subr.bf16.mxu0 %v3023_v50  ;;  %v1723_v0 = vld [vmem:[#allocation16 + $0x60] sm:$0xff] }
 0x2b8   : > { %3064 = vmatprep.subr.bf16.mxu1 %v3063_v47 }
 0x2b9   : > { %3066 = vmatpush3.bf16.msra.mxu1 %v3063_v47 }
 0x2ba   : > { %3026 = vmatpush3.bf16.msra.mxu0 %v3023_v50  ;;  %v3067_v50 = vpack.c.bf16 %v1714_v49, %v1713_v48 }
 0x2bb   : > { %3028 = vmatprep.subr.bf16.mxu0 %v3027_v53 }
 0x2bc   : > { %3068 = vmatprep.subr.bf16.mxu1 %v3067_v50 }
 0x2bd   : > { %3070 = vmatpush3.bf16.msra.mxu1 %v3067_v50 }
 0x2be   : > { %3030 = vmatpush3.bf16.msra.mxu0 %v3027_v53  ;;  %v3071_v53 = vpack.c.bf16 %v1716_v52, %v1715_v51 }
 0x2bf   : > { %3032 = vmatprep.subr.bf16.mxu0 %v3031_v56 }
 0x2c0   : > { %3072 = vmatprep.subr.bf16.mxu1 %v3071_v53 }
 0x2c1   : > { %2800 = vmatmul.mubr.f32.vlgmr.msra.gmra.mrb[0].mxu0 %v1239_v59  ;;  %3074 = vmatpush3.bf16.msra.mxu1 %v3071_v53  ;;  %v3079_v59 = vpack.c.bf16 %v1720_v58, %v1719_v57 }
 0x2c2   : > { %3034 = vmatpush3.bf16.msra.mxu0 %v3031_v56  ;;  %2802 = vmatprep.mubr.f32.mxu0 %v1240_v60  ;;  %v3075_v56 = vpack.c.bf16 %v1718_v55, %v1717_v54  ;;  %v1721_v60 = vld [vmem:[#allocation16 + $0x50] sm:$0xff] }
 0x2c3   : > { %3036 = vmatprep.subr.bf16.mxu0 %v3035_v61 }
 0x2c4   : > { %3076 = vmatprep.subr.bf16.mxu1 %v3075_v56 }
 0x2c5   : > { %2803 = vmatmul.mubr.f32.gmra.mrb[2].mxu0 %v1241_v1  ;;  %3078 = vmatpush3.bf16.msra.mxu1 %v3075_v56  ;;  %v1724_v1 = vld [vmem:[#allocation16 + $0x68] sm:$0xff] }
 0x2c6   : > { %3038 = vmatpush3.bf16.msra.mxu0 %v3035_v61  ;;  %2805 = vmatprep.mubr.f32.mxu0 %v1242_v2  ;;  %v1722_v61 = vld [vmem:[#allocation16 + $0x58] sm:$0xff]  ;;  %v3087_v2 = vpack.c.bf16 %v1724_v1, %v1723_v0 }
 0x2c7   : > { %3040 = vmatprep.subr.bf16.mxu0 %v3039_v3  ;;  %3080 = vmatprep.subr.bf16.mxu1 %v3079_v59  ;;  %v3083_v63 = vpack.c.bf16 %v1722_v61, %v1721_v60 }
 0x2c9   : > { %2806 = vmatmul.mubr.f32.gmra.mrb[4].mxu0 %v1243_v6  ;;  %3082 = vmatpush3.bf16.msra.mxu1 %v3079_v59  ;;  %v4643_v6 = vld [vmem:[%s5166_s13] ss:$0 sm:$0xff] }
 0x2ca   : > { %3042 = vmatpush3.bf16.msra.mxu0 %v3039_v3  ;;  %2808 = vmatprep.mubr.f32.mxu0 %v1244_v7  ;;  %v1725_v3 = vld [vmem:[#allocation16 + $0x70] sm:$0xff] }
 0x2cb   : > { %3044 = vmatprep.subr.bf16.mxu0 %v3043_v9  ;;  %3084 = vmatprep.subr.bf16.mxu1 %v3083_v63  ;;  %v3091_v5 = vpack.c.bf16 %v1726_v4, %v1725_v3 }
 0x2cd   : > { %2809 = vmatmul.mubr.f32.gmra.mrb[6].mxu0 %v1245_v12  ;;  %3086 = vmatpush3.bf16.msra.mxu1 %v3083_v63 }
 0x2ce   : > { %3046 = vmatpush3.bf16.msra.mxu0 %v3043_v9  ;;  %2811 = vmatprep.mubr.f32.mxu0 %v1246_v13 }
 0x2cf   : > { %3048 = vmatprep.subr.bf16.mxu0 %v3047_v14  ;;  %3088 = vmatprep.subr.bf16.mxu1 %v3087_v2 }
 0x2d1   : > { %2812 = vmatmul.mubr.f32.gmra.mrb[8].mxu0 %v1247_v16  ;;  %3090 = vmatpush3.bf16.msra.mxu1 %v3087_v2 }
 0x2d2   : > { %3050 = vmatpush3.bf16.msra.mxu0 %v3047_v14  ;;  %2814 = vmatprep.mubr.f32.mxu0 %v1248_v17 }
 0x2d3   : > { %3052 = vmatprep.subr.bf16.mxu0 %v3051_v18  ;;  %3092 = vmatprep.subr.bf16.mxu1 %v3091_v5 }
 0x2d5   : > { %2815 = vmatmul.mubr.f32.gmra.mrb[10].mxu0 %v1249_v21  ;;  %3094 = vmatpush3.bf16.msra.mxu1 %v3091_v5 }
 0x2d6   : > { %3054 = vmatpush3.bf16.msra.mxu0 %v3051_v18  ;;  %2817 = vmatprep.mubr.f32.mxu0 %v1250_v22 }
 0x2d7   : > { %3056 = vmatprep.subr.bf16.mxu0 %v3055_v23 }
 0x2d9   : > { %2818 = vmatmul.mubr.f32.gmra.mrb[12].mxu0 %v1251_v26 }
 0x2da   : > { %3058 = vmatpush3.bf16.msra.mxu0 %v3055_v23  ;;  %2820 = vmatprep.mubr.f32.mxu0 %v1252_v27 }
 0x2db   : > { %3060 = vmatprep.subr.bf16.mxu0 %v3059_v28 }
 0x2dd   : > { %2821 = vmatmul.mubr.f32.gmra.mrb[14].mxu0 %v1253_v15 }
 0x2de   : > { %3062 = vmatpush3.bf16.msra.mxu0 %v3059_v28  ;;  %2855 = vmatprep.mubr.f32.mxu0 %v4583_v29 }
 0x2e1   : > { %2856 = vmatmul.mubr.f32.vlgmr.msra.gmra.mrb[0].mxu0 %v4587_v30 }
 0x2e2   : > { %2858 = vmatprep.mubr.f32.mxu0 %v4590_v31 }
 0x2e5   : > { %2859 = vmatmul.mubr.f32.gmra.mrb[2].mxu0 %v4595_v32 }
 0x2e6   : > { %2861 = vmatprep.mubr.f32.mxu0 %v4598_v33 }
 0x2e9   : > { %2862 = vmatmul.mubr.f32.gmra.mrb[4].mxu0 %v4603_v34 }
 0x2ea   : > { %2864 = vmatprep.mubr.f32.mxu0 %v4606_v35 }
 0x2ed   : > { %2865 = vmatmul.mubr.f32.gmra.mrb[6].mxu0 %v4611_v36 }
 0x2ee   : > { %2867 = vmatprep.mubr.f32.mxu0 %v4614_v37 }
 0x2f1   : > { %2868 = vmatmul.mubr.f32.gmra.mrb[8].mxu0 %v4619_v38 }
 0x2f2   : > { %2870 = vmatprep.mubr.f32.mxu0 %v4622_v39 }
 0x2f5   : > { %2871 = vmatmul.mubr.f32.gmra.mrb[10].mxu0 %v4627_v40 }
 0x2f6   : > { %2873 = vmatprep.mubr.f32.mxu0 %v1234_v41 }
 0x2f9   : > { %2874 = vmatmul.mubr.f32.gmra.mrb[12].mxu0 %v4632_v42 }
 0x2fa   : > { %2876 = vmatprep.mubr.f32.mxu0 %v1236_v43 }
 0x2fd   : > { %2877 = vmatmul.mubr.f32.gmra.mrb[14].mxu0 %v4637_v44 }
 0x3b4   : > { %v2857_v7 = vpop.f32.mrb[0].mxu0 }
 0x3b5   : > { %v4646_v9 = vadd.f32 %v2857_v7, %v4643_v6  ;;  %v1497_v10 = vpop.f32.mrb[1].mxu0 }
 0x3b6   : > { %v4649_v11 = vadd.f32 %v4643_v6, %v1497_v10 }
 0x3b7   : > { %v2483_v12 = vmul.f32 -1.442695, %v4646_v9 }
 0x3b8   : > { %v2482_v13 = vmul.f32 -1.442695, %v4649_v11  ;;  %v2860_v14 = vpop.f32.mrb[2].mxu0 }
 0x3b9   : > { %3296 = vpow2.f32 %v2483_v12  ;;  %v4654_v62 = vadd.f32 %v2860_v14, %v4643_v6  ;;  %v1507_v8 = vpop.f32.mrb[3].mxu0 }
 0x3ba   : > { %3298 = vpow2.f32 %v2482_v13  ;;  %v4657_v16 = vadd.f32 %v4643_v6, %v1507_v8 }
 0x3bb   : > { %v2485_v17 = vmul.f32 -1.442695, %v4654_v62 }
 0x3bc   : > { %v2484_v18 = vmul.f32 -1.442695, %v4657_v16  ;;  %v2863_v19 = vpop.f32.mrb[4].mxu0 }
 0x3bd   : > { %3300 = vpow2.f32 %v2485_v17  ;;  %v4662_v20 = vadd.f32 %v2863_v19, %v4643_v6  ;;  %v1517_v21 = vpop.f32.mrb[5].mxu0 }
 0x3be   : > { %3302 = vpow2.f32 %v2484_v18  ;;  %v4665_v22 = vadd.f32 %v4643_v6, %v1517_v21 }
 0x3bf   : > { %v2487_v23 = vmul.f32 -1.442695, %v4662_v20 }
 0x3c0   : > { %v2486_v24 = vmul.f32 -1.442695, %v4665_v22  ;;  %v2866_v25 = vpop.f32.mrb[6].mxu0 }
 0x3c1   : > { %3304 = vpow2.f32 %v2487_v23  ;;  %v4670_v26 = vadd.f32 %v2866_v25, %v4643_v6  ;;  %v1527_v27 = vpop.f32.mrb[7].mxu0 }
 0x3c2   : > { %3306 = vpow2.f32 %v2486_v24  ;;  %v4673_v28 = vadd.f32 %v4643_v6, %v1527_v27 }
 0x3c3   : > { %v3297_v15 = vpop.eup %3296  ;;  %v2489_v41 = vmul.f32 -1.442695, %v4670_v26 }
 0x3c4   : > { %v3299_v43 = vpop.eup %3298  ;;  %v1648_v45 = vadd.f32 1.0, %v3297_v15  ;;  %v2488_v46 = vmul.f32 -1.442695, %v4673_v28  ;;  %v2869_v47 = vpop.f32.mrb[8].mxu0 }
 0x3c5   : > { %v1647_v48 = vadd.f32 1.0, %v3299_v43  ;;  %3308 = vpow2.f32 %v2489_v41  ;;  %v4678_v49 = vadd.f32 %v2869_v47, %v4643_v6  ;;  %v1537_v50 = vpop.f32.mrb[9].mxu0 }
 0x3c6   : > { %3310 = vrcp.f32 %v1648_v45  ;;  %v4681_v51 = vadd.f32 %v4643_v6, %v1537_v50 }
 0x3c7   : > { %v3301_v52 = vpop.eup %3300  ;;  %3312 = vrcp.f32 %v1647_v48  ;;  %v2491_v53 = vmul.f32 -1.442695, %v4678_v49 }
 0x3c8   : > { %v3303_v54 = vpop.eup %3302  ;;  %v1650_v55 = vadd.f32 1.0, %v3301_v52  ;;  %3314 = vpow2.f32 %v2488_v46  ;;  %v2490_v56 = vmul.f32 -1.442695, %v4681_v51  ;;  %v2872_v57 = vpop.f32.mrb[10].mxu0 }
 0x3c9   : > { %v1649_v58 = vadd.f32 1.0, %v3303_v54  ;;  %3316 = vpow2.f32 %v2491_v53  ;;  %v4686_v59 = vadd.f32 %v2872_v57, %v4643_v6  ;;  %v1547_v60 = vpop.f32.mrb[11].mxu0 }
 0x3ca   : > { %3318 = vrcp.f32 %v1650_v55  ;;  %v4689_v61 = vadd.f32 %v4643_v6, %v1547_v60 }
 0x3cb   : > { %v3305_v63 = vpop.eup %3304  ;;  %3320 = vrcp.f32 %v1649_v58  ;;  %v2493_v0 = vmul.f32 -1.442695, %v4686_v59 }
 0x3cc   : > { %v3307_v1 = vpop.eup %3306  ;;  %v1652_v2 = vadd.f32 1.0, %v3305_v63  ;;  %3322 = vpow2.f32 %v2490_v56  ;;  %v2492_v3 = vmul.f32 -1.442695, %v4689_v61  ;;  %v2875_v4 = vpop.f32.mrb[12].mxu0 }
 0x3cd   : > { %v1651_v5 = vadd.f32 1.0, %v3307_v1  ;;  %3324 = vpow2.f32 %v2493_v0  ;;  %v4694_v7 = vadd.f32 %v2875_v4, %v4643_v6  ;;  %v1557_v10 = vpop.f32.mrb[13].mxu0 }
 0x3ce   : > { %3326 = vrcp.f32 %v1652_v2  ;;  %v4697_v12 = vadd.f32 %v4643_v6, %v1557_v10 }
 0x3cf   : > { %v3309_v13 = vpop.eup %3308  ;;  %3328 = vrcp.f32 %v1651_v5  ;;  %v2495_v14 = vmul.f32 -1.442695, %v4694_v7 }
 0x3d0   : > { %v3311_v8 = vpop.eup %3310  ;;  %v1654_v17 = vadd.f32 1.0, %v3309_v13  ;;  %3330 = vpow2.f32 %v2492_v3  ;;  %v2494_v18 = vmul.f32 -1.442695, %v4697_v12  ;;  %v2878_v19 = vpop.f32.mrb[14].mxu0 }
 0x3d1   : > { %v3313_v21 = vpop.eup %3312  ;;  %3332 = vpow2.f32 %v2495_v14  ;;  %v4702_v23 = vadd.f32 %v2878_v19, %v4643_v6  ;;  %v1567_v24 = vpop.f32.mrb[15].mxu0  ;;  %v1696_v43 = vmul.f32 %v3311_v8, %v4646_v9 }
 0x3d2   : > { %v3315_v25 = vpop.eup %3314  ;;  %v4705_v27 = vadd.f32 %v4643_v6, %v1567_v24  ;;  %v1695_v15 = vmul.f32 %v3313_v21, %v4649_v11  ;;  %3334 = vpow2.f32 %v2494_v18 }
 0x3d3   : > { %v3317_v41 = vpop.eup %3316  ;;  %v1653_v45 = vadd.f32 1.0, %v3315_v25  ;;  %v2497_v46 = vmul.f32 -1.442695, %v4702_v23  ;;  %3336 = vrcp.f32 %v1654_v17 }
 0x3d4   : > { %v3319_v47 = vpop.eup %3318  ;;  %v1656_v48 = vadd.f32 1.0, %v3317_v41  ;;  %v2496_v50 = vmul.f32 -1.442695, %v4705_v27  ;;  %2911 = vmatprep.mubr.f32.mxu1 %v1695_v15 }
 0x3d5   : > { %v3321_v52 = vpop.eup %3320  ;;  %3338 = vrcp.f32 %v1653_v45  ;;  %2912 = vmatmul.mubr.f32.vlgmr.msra.gmra.mrb[0].mxu1 %v1696_v43  ;;  %v1698_v9 = vmul.f32 %v3319_v47, %v4654_v62 }
 0x3d6   : > { %v3323_v6 = vpop.eup %3322  ;;  %v1697_v53 = vmul.f32 %v3321_v52, %v4657_v16  ;;  %3340 = vrcp.f32 %v1656_v48 }
 0x3d7   : > { %v3325_v11 = vpop.eup %3324  ;;  %v1655_v54 = vadd.f32 1.0, %v3323_v6  ;;  %3342 = vpow2.f32 %v2497_v46 }
 0x3d8   : > { %v3327_v55 = vpop.eup %3326  ;;  %v1658_v56 = vadd.f32 1.0, %v3325_v11  ;;  %3344 = vpow2.f32 %v2496_v50  ;;  %2914 = vmatprep.mubr.f32.mxu1 %v1697_v53 }
 0x3d9   : > { %v3329_v57 = vpop.eup %3328  ;;  %3346 = vrcp.f32 %v1655_v54  ;;  %2915 = vmatmul.mubr.f32.gmra.mrb[2].mxu1 %v1698_v9  ;;  %v1700_v0 = vmul.f32 %v3327_v55, %v4662_v20 }
 0x3da   : > { %v3331_v58 = vpop.eup %3330  ;;  %v1699_v60 = vmul.f32 %v3329_v57, %v4665_v22  ;;  %3348 = vrcp.f32 %v1658_v56 }
 0x3db   : > { %v3333_v63 = vpop.eup %3332  ;;  %v1657_v16 = vadd.f32 1.0, %v3331_v58 }
 0x3dc   : > { %v1660_v1 = vadd.f32 1.0, %v3333_v63  ;;  %2917 = vmatprep.mubr.f32.mxu1 %v1699_v60  ;;  %v3335_v62 = vpop.eup %3334 }
 0x3dd   : > { %3350 = vrcp.f32 %v1657_v16  ;;  %2918 = vmatmul.mubr.f32.gmra.mrb[4].mxu1 %v1700_v0  ;;  %v3337_v2 = vpop.eup %3336  ;;  %v1659_v3 = vadd.f32 1.0, %v3335_v62 }
 0x3de   : > { %3352 = vrcp.f32 %v1660_v1  ;;  %v1702_v22 = vmul.f32 %v3337_v2, %v4670_v26 }
 0x3df   : > { %v3339_v4 = vpop.eup %3338  ;;  %3354 = vrcp.f32 %v1659_v3 }
 0x3e0   : > { %v3341_v5 = vpop.eup %3340  ;;  %v1701_v10 = vmul.f32 %v3339_v4, %v4673_v28 }
 0x3e1   : > { %v3343_v13 = vpop.eup %3342  ;;  %v1704_v19 = vmul.f32 %v3341_v5, %v4678_v49 }
 0x3e2   : > { %v3345_v14 = vpop.eup %3344  ;;  %v1662_v20 = vadd.f32 1.0, %v3343_v13  ;;  %2920 = vmatprep.mubr.f32.mxu1 %v1701_v10 }
 0x3e3   : > { %v3347_v8 = vpop.eup %3346  ;;  %v1661_v17 = vadd.f32 1.0, %v3345_v14  ;;  %2921 = vmatmul.mubr.f32.gmra.mrb[6].mxu1 %v1702_v22 }
 0x3e4   : > { %v1703_v18 = vmul.f32 %v3347_v8, %v4681_v51  ;;  %3356 = vrcp.f32 %v1662_v20  ;;  %v3349_v21 = vpop.eup %3348  ;;  %v1879_v20 = vlaneseq }
 0x3e5   : > { %3358 = vrcp.f32 %v1661_v17  ;;  %v1706_v26 = vmul.f32 %v3349_v21, %v4686_v59  ;;  %v2498_v59 = vld [vmem:[%s5167_s11] ss:$0 sm:$0xff] }
 0x3e6   : > { %2923 = vmatprep.mubr.f32.mxu1 %v1703_v18  ;;  %v1880_v8 = vand.u32 127, %v1879_v20 }
 0x3e7   : > { %v3351_v24 = vpop.eup %3350  ;;  %2924 = vmatmul.mubr.f32.gmra.mrb[8].mxu1 %v1704_v19  ;;  %v3781_v19 = vmov 0.0  }
 0x3e8   : > { %v1705_v28 = vmul.f32 %v3351_v24, %v4689_v61  ;;  %v3353_v25 = vpop.eup %3352  ;;  %vm1881_vm11 = vcmp.lt.s32.totalorder %v1880_v8, 32 }
 0x3e9   : > { %v3355_v15 = vpop.eup %3354  ;;  %v1708_v51 = vmul.f32 %v3353_v25, %v4694_v7  ;;  %v4773_v21 = vsel %vm1881_vm11, 1.0, %v3781_v19 }
 0x3ea   : > { %2926 = vmatprep.mubr.f32.mxu1 %v1705_v28  ;;  %v1707_v41 = vmul.f32 %v3355_v15, %v4697_v12 }
 0x3eb   : > { %2927 = vmatmul.mubr.f32.gmra.mrb[10].mxu1 %v1706_v26 }
 0x3ec   : > { %2929 = vmatprep.mubr.f32.mxu1 %v1707_v41 }
 0x3ee   : > { %v3357_v43 = vpop.eup %3356 }
 0x3ef   : > { %v3359_v49 = vpop.eup %3358  ;;  %2930 = vmatmul.mubr.f32.gmra.mrb[12].mxu1 %v1708_v51  ;;  %v1710_v46 = vmul.f32 %v3357_v43, %v4702_v23 }
 0x3f0   : > { %v1709_v45 = vmul.f32 %v3359_v49, %v4705_v27 }
 0x3f2   : > { %2932 = vmatprep.mubr.f32.mxu1 %v1709_v45 }
 0x3f3   : > { %2933 = vmatmul.mubr.f32.gmra.mrb[14].mxu1 %v1710_v46 }
 0x4a8   : > { %v2913_v61 = vpop.f32.mrb[0].mxu1 }
 0x4a9   : > { %v1806_v47 = vadd.f32 %v2913_v61, %v2498_v59  ;;  %v1800_v12 = vpop.f32.mrb[1].mxu1 }
 0x4aa   : > { %v4728_v7 = vadd.f32 %v2498_v59, %v1800_v12 }
 0x4ab   : > { %1886 = vadd.xlane.f32.xlu0 %v1806_v47 }
 0x4ac   : > { %v2916_v48 = vpop.f32.mrb[2].mxu1 }
 0x4ad   : > { %v4730_v50 = vadd.f32 %v2916_v48, %v2498_v59  ;;  %v1810_v52 = vpop.f32.mrb[3].mxu1 }
 0x4ae   : > { %v4734_v27 = vadd.f32 %v2498_v59, %v1810_v52 }
 0x4af   : > { %1884 = vadd.xlane.f32.xlu0 %v4728_v7  ;;  %1890 = vadd.xlane.f32.xlu1 %v4730_v50 }
 0x4b0   : > { %v2919_v23 = vpop.f32.mrb[4].mxu1 }
 0x4b1   : > { %v1820_v6 = vpop.f32.mrb[5].mxu1  ;;  %v4740_v11 = vadd.f32 %v2919_v23, %v2498_v59 }
 0x4b2   : > { %v4736_v53 = vadd.f32 %v2498_v59, %v1820_v6 }
 0x4b3   : > { %1888 = vadd.xlane.f32.xlu1 %v4734_v27 }
 0x4b4   : > { %1892 = vadd.xlane.f32.xlu0 %v4736_v53 }
 0x4b6   : > { %v2922_v9 = vpop.f32.mrb[6].mxu1 }
 0x4b7   : > { %v1830_v54 = vpop.f32.mrb[7].mxu1  ;;  %1894 = vadd.xlane.f32.xlu1 %v4740_v11  ;;  %v4745_v56 = vadd.f32 %v2922_v9, %v2498_v59 }
 0x4b8   : > { %v4743_v55 = vadd.f32 %v2498_v59, %v1830_v54 }
 0x4ba   : > { %1896 = vadd.xlane.f32.xlu0 %v4743_v55  ;;  %v2925_v57 = vpop.f32.mrb[8].mxu1 }
 0x4bb   : > { %v1840_v58 = vpop.f32.mrb[9].mxu1  ;;  %1898 = vadd.xlane.f32.xlu1 %v4745_v56  ;;  %v4751_v63 = vadd.f32 %v2925_v57, %v2498_v59 }
 0x4bc   : > { %v4749_v60 = vadd.f32 %v2498_v59, %v1840_v58 }
 0x4be   : > { %1900 = vadd.xlane.f32.xlu0 %v4749_v60  ;;  %v2928_v0 = vpop.f32.mrb[10].mxu1 }
 0x4bf   : > { %v1850_v16 = vpop.f32.mrb[11].mxu1  ;;  %1902 = vadd.xlane.f32.xlu1 %v4751_v63  ;;  %v4757_v62 = vadd.f32 %v2928_v0, %v2498_v59 }
 0x4c0   : > { %v4755_v1 = vadd.f32 %v2498_v59, %v1850_v16 }
 0x4c2   : > { %1904 = vadd.xlane.f32.xlu0 %v4755_v1  ;;  %v2931_v2 = vpop.f32.mrb[12].mxu1 }
 0x4c3   : > { %v1860_v3 = vpop.f32.mrb[13].mxu1  ;;  %1906 = vadd.xlane.f32.xlu1 %v4757_v62  ;;  %v4763_v5 = vadd.f32 %v2931_v2, %v2498_v59 }
 0x4c4   : > { %v4761_v4 = vadd.f32 %v2498_v59, %v1860_v3 }
 0x4c6   : > { %1908 = vadd.xlane.f32.xlu0 %v4761_v4  ;;  %v2934_v10 = vpop.f32.mrb[14].mxu1 }
 0x4c7   : > { %v1870_v13 = vpop.f32.mrb[15].mxu1  ;;  %1910 = vadd.xlane.f32.xlu1 %v4763_v5  ;;  %v4769_v14 = vadd.f32 %v2934_v10, %v2498_v59 }
 0x4c8   : > { %v4767_v22 = vadd.f32 %v2498_v59, %v1870_v13 }
 0x4ca   : > { %1912 = vadd.xlane.f32.xlu0 %v4767_v22 }
 0x4cb   : > { %1914 = vadd.xlane.f32.xlu1 %v4769_v14 }
 0x538   : > { %v1887_v17 = vpop.xlane.xlu0 %1886 }
 0x539   : > { %v1917_v18 = vmul.f32 0.03125, %v1887_v17 }
 0x53b   : > { %v1933_v24 = vsub.f32 %v1806_v47, %v1917_v18 }
 0x53c   : > { %v1885_v28 = vpop.xlane.xlu0 %1884  ;;  %v1891_v25 = vpop.xlane.xlu1 %1890 }
 0x53d   : > { %v1916_v26 = vmul.f32 0.03125, %v1885_v28  ;;  %v1919_v15 = vmul.f32 0.03125, %v1891_v25  ;;  %v4776_v41 = vmul.f32 %v4773_v21, %v1933_v24 }
 0x53f   : > { %v1932_v51 = vsub.f32 %v4728_v7, %v1916_v26  ;;  %v1935_v43 = vsub.f32 %v4730_v50, %v1919_v15  ;;  %v1965_v49 = vmul.f32 %v4776_v41, %v4776_v41 }
 0x540   : > { %v1889_v45 = vpop.xlane.xlu1 %1888 }
 0x541   : > { %v1918_v46 = vmul.f32 0.03125, %v1889_v45  ;;  %v1893_v59 = vpop.xlane.xlu0 %1892  ;;  %1982 = vadd.xlane.f32.xlu1 %v1965_v49  ;;  %v4783_v61 = vmul.f32 %v4773_v21, %v1935_v43  ;;  %v4786_v47 = vmul.f32 %v4773_v21, %v1932_v51 }
 0x542   : > { %v1920_v12 = vmul.f32 0.03125, %v1893_v59 }
 0x543   : > { %v1934_v48 = vsub.f32 %v4734_v27, %v1918_v46  ;;  %v1967_v7 = vmul.f32 %v4783_v61, %v4783_v61  ;;  %v1964_v50 = vmul.f32 %v4786_v47, %v4786_v47 }
 0x544   : > { %v1936_v52 = vsub.f32 %v4736_v53, %v1920_v12  ;;  %v1895_v23 = vpop.xlane.xlu1 %1894 }
 0x545   : > { %v1921_v6 = vmul.f32 0.03125, %v1895_v23  ;;  %1986 = vadd.xlane.f32.xlu1 %v1967_v7  ;;  %1980 = vadd.xlane.f32.xlu0 %v1964_v50  ;;  %v4795_v9 = vmul.f32 %v4773_v21, %v1934_v48 }
 0x546   : > { %v4801_v58 = vmul.f32 %v4773_v21, %v1936_v52 }
 0x547   : > { %v1937_v54 = vsub.f32 %v4740_v11, %v1921_v6  ;;  %v1897_v57 = vpop.xlane.xlu0 %1896  ;;  %v1966_v27 = vmul.f32 %v4795_v9, %v4795_v9 }
 0x548   : > { %v1922_v0 = vmul.f32 0.03125, %v1897_v57  ;;  %v1899_v16 = vpop.xlane.xlu1 %1898  ;;  %v1968_v20 = vmul.f32 %v4801_v58, %v4801_v58 }
 0x549   : > { %v1923_v2 = vmul.f32 0.03125, %v1899_v16  ;;  %1984 = vadd.xlane.f32.xlu0 %v1966_v27  ;;  %v4804_v53 = vmul.f32 %v4773_v21, %v1937_v54 }
 0x54a   : > { %v1938_v3 = vsub.f32 %v4743_v55, %v1922_v0 }
 0x54b   : > { %v1939_v10 = vsub.f32 %v4745_v56, %v1923_v2  ;;  %v1901_v13 = vpop.xlane.xlu0 %1900  ;;  %v1969_v11 = vmul.f32 %v4804_v53, %v4804_v53 }
 0x54c   : > { %v1924_v8 = vmul.f32 0.03125, %v1901_v13  ;;  %v1903_v17 = vpop.xlane.xlu1 %1902  ;;  %v4813_v18 = vmul.f32 %v4773_v21, %v1938_v3 }
 0x54d   : > { %v1925_v19 = vmul.f32 0.03125, %v1903_v17  ;;  %1990 = vadd.xlane.f32.xlu1 %v1969_v11  ;;  %1988 = vadd.xlane.f32.xlu0 %v1968_v20  ;;  %v4816_v24 = vmul.f32 %v4773_v21, %v1939_v10 }
 0x54e   : > { %v1940_v55 = vsub.f32 %v4749_v60, %v1924_v8  ;;  %v1970_v26 = vmul.f32 %v4813_v18, %v4813_v18 }
 0x54f   : > { %v1941_v56 = vsub.f32 %v4751_v63, %v1925_v19  ;;  %v1905_v28 = vpop.xlane.xlu0 %1904  ;;  %v1971_v25 = vmul.f32 %v4816_v24, %v4816_v24 }
 0x550   : > { %v1926_v15 = vmul.f32 0.03125, %v1905_v28  ;;  %v1907_v51 = vpop.xlane.xlu1 %1906  ;;  %v4825_v43 = vmul.f32 %v4773_v21, %v1940_v55 }
 0x551   : > { %v1927_v49 = vmul.f32 0.03125, %v1907_v51  ;;  %1994 = vadd.xlane.f32.xlu1 %v1971_v25  ;;  %1992 = vadd.xlane.f32.xlu0 %v1970_v26  ;;  %v4828_v45 = vmul.f32 %v4773_v21, %v1941_v56 }
 0x552   : > { %v1942_v60 = vsub.f32 %v4755_v1, %v1926_v15  ;;  %v1972_v12 = vmul.f32 %v4825_v43, %v4825_v43 }
 0x553   : > { %v1943_v63 = vsub.f32 %v4757_v62, %v1927_v49  ;;  %v1909_v46 = vpop.xlane.xlu0 %1908  ;;  %v1973_v59 = vmul.f32 %v4828_v45, %v4828_v45 }
 0x554   : > { %v1928_v48 = vmul.f32 0.03125, %v1909_v46  ;;  %v1911_v7 = vpop.xlane.xlu1 %1910  ;;  %v4837_v50 = vmul.f32 %v4773_v21, %v1942_v60 }
 0x555   : > { %v1929_v52 = vmul.f32 0.03125, %v1911_v7  ;;  %1998 = vadd.xlane.f32.xlu1 %v1973_v59  ;;  %1996 = vadd.xlane.f32.xlu0 %v1972_v12  ;;  %v4840_v23 = vmul.f32 %v4773_v21, %v1943_v63 }
 0x556   : > { %v1944_v1 = vsub.f32 %v4761_v4, %v1928_v48  ;;  %v1974_v57 = vmul.f32 %v4837_v50, %v4837_v50  ;;  %v4873_v48 = vld [vmem:[%s5168_s25] ss:$0 sm:$0xff] }
 0x557   : > { %v1945_v62 = vsub.f32 %v4763_v5, %v1929_v52  ;;  %v1913_v6 = vpop.xlane.xlu0 %1912  ;;  %v1975_v54 = vmul.f32 %v4840_v23, %v4840_v23 }
 0x558   : > { %v1930_v27 = vmul.f32 0.03125, %v1913_v6  ;;  %v1915_v0 = vpop.xlane.xlu1 %1914  ;;  %v4849_v16 = vmul.f32 %v4773_v21, %v1944_v1 }
 0x559   : > { %v1931_v2 = vmul.f32 0.03125, %v1915_v0  ;;  %2002 = vadd.xlane.f32.xlu1 %v1975_v54  ;;  %2000 = vadd.xlane.f32.xlu0 %v1974_v57  ;;  %v4852_v3 = vmul.f32 %v4773_v21, %v1945_v62  ;;  %v4879_v54 = vld [vmem:[%s5169_s23] ss:$0 sm:$0xff] }
 0x55a   : > { %v1946_v4 = vsub.f32 %v4767_v22, %v1930_v27  ;;  %v1976_v13 = vmul.f32 %v4849_v16, %v4849_v16 }
 0x55b   : > { %v1947_v5 = vsub.f32 %v4769_v14, %v1931_v2  ;;  %v1977_v10 = vmul.f32 %v4852_v3, %v4852_v3 }
 0x55c   : > { %v4861_v11 = vmul.f32 %v4773_v21, %v1946_v4 }
 0x55d   : > { %2006 = vadd.xlane.f32.xlu1 %v1977_v10  ;;  %2004 = vadd.xlane.f32.xlu0 %v1976_v13  ;;  %v4864_v20 = vmul.f32 %v4773_v21, %v1947_v5 }
 0x55e   : > { %v1978_v22 = vmul.f32 %v4861_v11, %v4861_v11 }
 0x55f   : > { %v1979_v8 = vmul.f32 %v4864_v20, %v4864_v20 }
 0x561   : > { %2010 = vadd.xlane.f32.xlu1 %v1979_v8  ;;  %2008 = vadd.xlane.f32.xlu0 %v1978_v22 }
 0x5ce   : > { %v1983_v14 = vpop.xlane.xlu1 %1982 }
 0x5cf   : > { %v2013_v17 = vmul.f32 0.03125, %v1983_v14 }
 0x5d1   : > { %v2029_v19 = vadd.f32 1e-05, %v2013_v17 }
 0x5d2   : > { %v1987_v55 = vpop.xlane.xlu1 %1986  ;;  %v1981_v56 = vpop.xlane.xlu0 %1980 }
 0x5d3   : > { %3360 = vrsqrt.f32 %v2029_v19  ;;  %v2015_v28 = vmul.f32 0.03125, %v1987_v55  ;;  %v2012_v25 = vmul.f32 0.03125, %v1981_v56 }
 0x5d5   : > { %v2031_v26 = vadd.f32 1e-05, %v2015_v28  ;;  %v2028_v15 = vadd.f32 1e-05, %v2012_v25 }
 0x5d6   : > { %v1985_v21 = vpop.xlane.xlu0 %1984 }
 0x5d7   : > { %3362 = vrsqrt.f32 %v2031_v26  ;;  %v2014_v51 = vmul.f32 0.03125, %v1985_v21 }
 0x5d8   : > { %3364 = vrsqrt.f32 %v2028_v15 }
 0x5d9   : > { %v2030_v49 = vadd.f32 1e-05, %v2014_v51 }
 0x5da   : > { %v1991_v60 = vpop.xlane.xlu1 %1990  ;;  %v1989_v63 = vpop.xlane.xlu0 %1988 }
 0x5db   : > { %3366 = vrsqrt.f32 %v2030_v49  ;;  %v2017_v46 = vmul.f32 0.03125, %v1991_v60  ;;  %v2016_v59 = vmul.f32 0.03125, %v1989_v63 }
 0x5dd   : > { %v3361_v12 = vpop.eup %3360  ;;  %v2033_v7 = vadd.f32 1e-05, %v2017_v46  ;;  %v2032_v52 = vadd.f32 1e-05, %v2016_v59 }
 0x5de   : > { %v2061_v1 = vmul.f32 %v3361_v12, %v4776_v41  ;;  %v1995_v62 = vpop.xlane.xlu1 %1994  ;;  %v1993_v6 = vpop.xlane.xlu0 %1992 }
 0x5df   : > { %3368 = vrsqrt.f32 %v2033_v7  ;;  %v2019_v57 = vmul.f32 0.03125, %v1995_v62  ;;  %v2018_v27 = vmul.f32 0.03125, %v1993_v6 }
 0x5e0   : > { %v2084_v0 = vmul.f32 %v4873_v48, %v2061_v1  ;;  %3370 = vrsqrt.f32 %v2032_v52 }
 0x5e1   : > { %v3363_v2 = vpop.eup %3362  ;;  %v2035_v4 = vadd.f32 1e-05, %v2019_v57  ;;  %v2034_v5 = vadd.f32 1e-05, %v2018_v27 }
 0x5e2   : > { %v3365_v10 = vpop.eup %3364  ;;  %v2107_v41 = vadd.f32 %v4879_v54, %v2084_v0  ;;  %v2063_v13 = vmul.f32 %v3363_v2, %v4783_v61  ;;  %v1999_v8 = vpop.xlane.xlu1 %1998 }
 0x5e3   : > { %v1997_v22 = vpop.xlane.xlu0 %1996  ;;  %v2060_v14 = vmul.f32 %v3365_v10, %v4786_v47  ;;  %3372 = vrsqrt.f32 %v2035_v4  ;;  %v2021_v17 = vmul.f32 0.03125, %v1999_v8 }
 0x5e4   : > { %v2020_v19 = vmul.f32 0.03125, %v1997_v22  ;;  %v2123_v55 = vadd.f32 %v2107_v41, %v4587_v30  ;;  %v2086_v56 = vmul.f32 %v4873_v48, %v2063_v13  ;;  %3374 = vrsqrt.f32 %v2034_v5 }
 0x5e5   : > { %v3367_v28 = vpop.eup %3366  ;;  %v2083_v25 = vmul.f32 %v4873_v48, %v2060_v14  ;;  %v2037_v26 = vadd.f32 1e-05, %v2021_v17 }
 0x5e6   : > { %v2036_v15 = vadd.f32 1e-05, %v2020_v19  ;;  %2139 = vst [vmem:[%s4315_s15 + $0x8] sm:$0xff] %v2123_v55  ;;  %v2109_v61 = vadd.f32 %v4879_v54, %v2086_v56  ;;  %v2062_v21 = vmul.f32 %v3367_v28, %v4795_v9  ;;  %v2003_v47 = vpop.xlane.xlu1 %2002 }
 0x5e7   : > { %v2001_v51 = vpop.xlane.xlu0 %2000  ;;  %v2106_v49 = vadd.f32 %v4879_v54, %v2083_v25  ;;  %3376 = vrsqrt.f32 %v2037_v26  ;;  %v2023_v30 = vmul.f32 0.03125, %v2003_v47 }
 0x5e8   : > { %v2022_v60 = vmul.f32 0.03125, %v2001_v51  ;;  %v2125_v63 = vadd.f32 %v2109_v61, %v4595_v32  ;;  %v2085_v46 = vmul.f32 %v4873_v48, %v2062_v21  ;;  %3378 = vrsqrt.f32 %v2036_v15 }
 0x5e9   : > { %v3369_v59 = vpop.eup %3368  ;;  %v2122_v12 = vadd.f32 %v2106_v49, %v4583_v29  ;;  %v2039_v7 = vadd.f32 1e-05, %v2023_v30 }
 0x5ea   : > { %v2038_v52 = vadd.f32 1e-05, %v2022_v60  ;;  %v3371_v1 = vpop.eup %3370  ;;  %2141 = vst [vmem:[%s4315_s15 + $0x18] sm:$0xff] %v2125_v63  ;;  %v2108_v9 = vadd.f32 %v4879_v54, %v2085_v46  ;;  %v2065_v62 = vmul.f32 %v3369_v59, %v4804_v53  ;;  %v2007_v6 = vpop.xlane.xlu1 %2006 }
 0x5eb   : > { %v2005_v57 = vpop.xlane.xlu0 %2004  ;;  %2138 = vst [vmem:[%s4315_s15] sm:$0xff] %v2122_v12  ;;  %v2064_v32 = vmul.f32 %v3371_v1, %v4801_v58  ;;  %3380 = vrsqrt.f32 %v2039_v7  ;;  %v2025_v27 = vmul.f32 0.03125, %v2007_v6 }
 0x5ec   : > { %v2024_v0 = vmul.f32 0.03125, %v2005_v57  ;;  %v2124_v2 = vadd.f32 %v2108_v9, %v4590_v31  ;;  %v2088_v29 = vmul.f32 %v4873_v48, %v2065_v62  ;;  %3382 = vrsqrt.f32 %v2038_v52 }
 0x5ed   : > { %v3373_v4 = vpop.eup %3372  ;;  %v2087_v5 = vmul.f32 %v4873_v48, %v2064_v32  ;;  %v2041_v10 = vadd.f32 1e-05, %v2025_v27 }
 0x5ee   : > { %v2040_v41 = vadd.f32 1e-05, %v2024_v0  ;;  %v3375_v53 = vpop.eup %3374  ;;  %2140 = vst [vmem:[%s4315_s15 + $0x10] sm:$0xff] %v2124_v2  ;;  %v2111_v13 = vadd.f32 %v4879_v54, %v2088_v29  ;;  %v2067_v8 = vmul.f32 %v3373_v4, %v4816_v24  ;;  %v2011_v58 = vpop.xlane.xlu1 %2010  ;;  %v3392_v29 = vld [vmem:[%s4294_s1 + $0x60] sm:$0xff] }
 0x5ef   : > { %v2009_v22 = vpop.xlane.xlu0 %2008  ;;  %v2110_v14 = vadd.f32 %v4879_v54, %v2087_v5  ;;  %v2066_v31 = vmul.f32 %v3375_v53, %v4813_v18  ;;  %3384 = vrsqrt.f32 %v2041_v10  ;;  %v2027_v17 = vmul.f32 0.03125, %v2011_v58  ;;  %v3393_v53 = vld [vmem:[%s4294_s1 + $0x70] sm:$0xff] }
 0x5f0   : > { %v2127_v19 = vadd.f32 %v2111_v13, %v4603_v34  ;;  %v2090_v55 = vmul.f32 %v4873_v48, %v2067_v8  ;;  %3386 = vrsqrt.f32 %v2040_v41  ;;  %v2026_v56 = vmul.f32 0.03125, %v2009_v22 }
 0x5f1   : > { %v3377_v28 = vpop.eup %3376  ;;  %v2126_v25 = vadd.f32 %v2110_v14, %v4598_v33  ;;  %v2089_v24 = vmul.f32 %v4873_v48, %v2066_v31  ;;  %v2043_v26 = vadd.f32 1e-05, %v2027_v17 }
 0x5f2   : > { %v3379_v15 = vpop.eup %3378  ;;  %2143 = vst [vmem:[%s4315_s15 + $0x28] sm:$0xff] %v2127_v19  ;;  %v2113_v18 = vadd.f32 %v4879_v54, %v2090_v55  ;;  %v2069_v61 = vmul.f32 %v3377_v28, %v4828_v45  ;;  %v2042_v21 = vadd.f32 1e-05, %v2026_v56 }
 0x5f3   : > { %2142 = vst [vmem:[%s4315_s15 + $0x20] sm:$0xff] %v2126_v25  ;;  %v2112_v34 = vadd.f32 %v4879_v54, %v2089_v24  ;;  %v2068_v47 = vmul.f32 %v3379_v15, %v4825_v43  ;;  %3388 = vrsqrt.f32 %v2043_v26 }
 0x5f4   : > { %v2129_v33 = vadd.f32 %v2113_v18, %v4611_v36  ;;  %v2092_v51 = vmul.f32 %v4873_v48, %v2069_v61  ;;  %3390 = vrsqrt.f32 %v2042_v21 }
 0x5f5   : > { %v3381_v49 = vpop.eup %3380  ;;  %v2128_v30 = vadd.f32 %v2112_v34, %v4606_v35  ;;  %v2091_v60 = vmul.f32 %v4873_v48, %v2068_v47 }
 0x5f6   : > { %v3383_v45 = vpop.eup %3382  ;;  %2145 = vst [vmem:[%s4315_s15 + $0x38] sm:$0xff] %v2129_v33  ;;  %v2115_v63 = vadd.f32 %v4879_v54, %v2092_v51  ;;  %v2071_v46 = vmul.f32 %v3381_v49, %v4840_v23 }
 0x5f7   : > { %2144 = vst [vmem:[%s4315_s15 + $0x30] sm:$0xff] %v2128_v30  ;;  %v2114_v43 = vadd.f32 %v4879_v54, %v2091_v60  ;;  %v2070_v36 = vmul.f32 %v3383_v45, %v4837_v50 }
 0x5f8   : > { %v2131_v59 = vadd.f32 %v2115_v63, %v4619_v38  ;;  %v2094_v12 = vmul.f32 %v4873_v48, %v2071_v46 }
 0x5f9   : > { %v3385_v7 = vpop.eup %3384  ;;  %v2130_v35 = vadd.f32 %v2114_v43, %v4614_v37  ;;  %v2093_v52 = vmul.f32 %v4873_v48, %v2070_v36 }
 0x5fa   : > { %v3387_v1 = vpop.eup %3386  ;;  %2147 = vst [vmem:[%s4315_s15 + $0x48] sm:$0xff] %v2131_v59  ;;  %v2117_v23 = vadd.f32 %v4879_v54, %v2094_v12  ;;  %v2073_v9 = vmul.f32 %v3385_v7, %v4852_v3 }
 0x5fb   : > { %2146 = vst [vmem:[%s4315_s15 + $0x40] sm:$0xff] %v2130_v35  ;;  %v2116_v50 = vadd.f32 %v4879_v54, %v2093_v52  ;;  %v2072_v38 = vmul.f32 %v3387_v1, %v4849_v16 }
 0x5fc   : > { %v2133_v62 = vadd.f32 %v2117_v23, %v4627_v40  ;;  %v2096_v6 = vmul.f32 %v4873_v48, %v2073_v9 }
 0x5fd   : > { %v3389_v37 = vpop.eup %3388  ;;  %v2132_v57 = vadd.f32 %v2116_v50, %v4622_v39  ;;  %v2095_v32 = vmul.f32 %v4873_v48, %v2072_v38 }
 0x5fe   : > { %v3391_v27 = vpop.eup %3390  ;;  %2149 = vst [vmem:[%s4315_s15 + $0x58] sm:$0xff] %v2133_v62  ;;  %v2119_v3 = vadd.f32 %v4879_v54, %v2096_v6  ;;  %v2075_v0 = vmul.f32 %v3389_v37, %v4864_v20 }
 0x5ff   : > { %2148 = vst [vmem:[%s4315_s15 + $0x50] sm:$0xff] %v2132_v57  ;;  %v2118_v40 = vadd.f32 %v4879_v54, %v2095_v32  ;;  %v2074_v16 = vmul.f32 %v3391_v27, %v4861_v11 }
 0x600   : > { %v2135_v2 = vadd.f32 %v2119_v3, %v4632_v42  ;;  %v2098_v39 = vmul.f32 %v4873_v48, %v2075_v0 }
 0x601   : > { %v2134_v4 = vadd.f32 %v3392_v29, %v2118_v40  ;;  %v2097_v5 = vmul.f32 %v4873_v48, %v2074_v16 }
 0x602   : > { %2151 = vst [vmem:[%s4315_s15 + $0x68] sm:$0xff] %v2135_v2  ;;  %v2121_v10 = vadd.f32 %v4879_v54, %v2098_v39 }
 0x603   : > { %2150 = vst [vmem:[%s4315_s15 + $0x60] sm:$0xff] %v2134_v4  ;;  %v2120_v20 = vadd.f32 %v4879_v54, %v2097_v5 }
 0x604   : > { %v2137_v41 = vadd.f32 %v2121_v10, %v4637_v44 }
 0x605   : > { %v2136_v13 = vadd.f32 %v3393_v53, %v2120_v20 }
 0x606   : > { %2153 = vst [vmem:[%s4315_s15 + $0x78] sm:$0xff] %v2137_v41 }
 0x607   : > { %2152 = vst [vmem:[%s4315_s15 + $0x70] sm:$0xff] %v2136_v13 }
 0x608 PF: > { %s5170_s12 = sld [smem:[#allocation34_spill]]  ;;  %s5172_s0 = sld [smem:[#allocation36_spill]] }
 0x609   : > { %s5173_s2 = sld [smem:[#allocation49_spill]]  ;;  %s2168_s22 = sshll.u32 %s4315_s15, 4  ;;  %s4967_s22 = int_to_ptr.vmem [resolvable:$true] %s2168_s22 }
 0x60a   : > { %s4971_s1 = scalar_lea.sflag [#allocation9], %s466_s10  ;;  %s3602_s25 = scalar_lea.vmem %s4967_s22, 2048 }
 0x60b   : > { %p3603_p3 = scmp.ne.s32.totalorder %s4967_s22, %s3602_s25  ;;  %s3782_s28 = smov [#allocation18]  }
 0x60c   : > { %s3606_s8 = sshll.u32 %s3782_s28, 4  ;;  %s3607_s8 = int_to_ptr.vmem [resolvable:$false] %s3606_s8 }
 0x60d   : > { %s3608_s23 = scalar_lea.vmem %s3607_s8, 4096  ;;  %p3609_p6 = scmp.lt.s32.totalorder %s4967_s22, %s3607_s8 }
 0x60e   : > { %s2510_s29 = sshll.u32 %s5170_s12, 11  ;;  %p5175_p12 = scmp.ne.s32.totalorder %s5172_s0, 0 }
 0x60f   : > { %s5174_s11 = smov %s5173_s2  ;;  %s4964_s14 = scalar_lea.hbm %s5173_s2, %s2510_s29 }
 0x610   : > { %p3604_p0 = pnand %p3603_p3, %p5175_p12  ;;  %p3610_p11 = scmp.lt.s32.totalorder %s3608_s23, %s3602_s25 }
 0x612   : > { %p3605_p9 = pneg %p3604_p0  ;;  %p3611_p7 = por %p3610_p11, %p3609_p6 }
 0x614   : > { %p3612_p5 = pnand %p3611_p7, %p3605_p9 }
 0x616   : > { %3615 = shalt.err (!%p3612_p5)
}
 0x617   : > { %s3616_s10 = scalar_lea.hbm %s4964_s14, 2048  ;;  %s3620_s6 = scalar_lea.hbm %s5174_s11, 6144 }
 0x618   : > { %p3617_p4 = scmp.ne.s32.totalorder %s4964_s14, %s3616_s10  ;;  %p3621_p8 = scmp.lt.u32.totalorder %s4964_s14, %s5174_s11 }
 0x619   : > { %p3622_p10 = scmp.lt.u32.totalorder %s3620_s6, %s3616_s10  ;;  %p3624_p3 = scmp.lt.u32.totalorder %s3616_s10, %s4964_s14 }
 0x61a   : > { %p3618_p1 = pnand %p3617_p4, %p5175_p12 }
 0x61b   : > { %p3623_p13 = por %p3622_p10, %p3621_p8 }
 0x61c   : > { %p3619_p2 = pneg %p3618_p1 }
 0x61d   : > { %p3625_p0 = por %p3624_p3, %p3623_p13 }
 0x61f   : > { %p3626_p9 = pnand %p3625_p0, %p3619_p2 }
 0x621   : > { %3629 = shalt.err (!%p3626_p9)
}
 0x622   : > { %s3783_s9 = smov 128   ;;  %s3784_s2 = smov 8  }
 0x623   : > { %3133 = dma.vmem_to_hbm [thread:$0]  (%p5175_p12), %s4967_s22, 2048, %s4964_s14, %s4971_s1, %s3783_s9, %s3783_s9, %s3784_s2  }
 0x624 PF: > { %s5176_s25 = sld [smem:[#allocation30_spill]]  ;;  %s5177_s28 = sld [smem:[#allocation38_spill]] }
 0x625   : > { %p3170_p6 = scmp.ge.s32.totalorder %s3766_s21, 2 }
 0x62a   : > { %s2183_s8 = sand.u32 1, %s5176_s25   ;;  %p5178_p11 = scmp.ne.s32.totalorder %s5177_s28, 0 }
 0x62b   : > { %s2184_s23 = scalar_lea.sflag [#allocation9], %s2183_s8 }
 0x62c   : > { %p3160_p7 = pnand %p3170_p6, %p5178_p11 }
 0x62e   : > { %3709 = dma.done.wait (!%p3160_p7), %s2184_s23, 2048  }
 0x62f   : > { %3711 = vsyncadd (!%p3160_p7), %s2184_s23, 4294965248  ;;  %s46_s21 = sadd.s32 1, %s3766_s21   ;;  %s5180_s28 = sld [smem:[#allocation31_spill]] }
 0x630   : > { %p5000_p5 = scmp.ge.s32.totalorder %s46_s21, 11   ;;  %s5181_s14 = sld [smem:[#allocation32_spill]] }
 0x631   : > { %s5182_s0 = smov %s5199_s17  ;;  %s5183_s2 = smov %s3718_s26 }
 0x632   : > { %s5184_s26 = smov %s3722_s27  ;;  %s5185_s27 = smov %s4171_s4 }
 0x633   : > { %s5186_s29 = smov %s3734_s30  ;;  %s5187_s30 = smov %s4149_s7 }
 0x634   : > { %s5188_s15 = smov %s3746_s16  ;;  %s5189_s16 = smov %s4156_s18 }
 0x635   : > { %s5190_s17 = smov %s3758_s19  ;;  %s5191_s18 = smov %s3762_s20 }
 0x636   : > { %s5192_s19 = smov %s5195_s24  ;;  %s5193_s20 = smov %s5182_s0 }
 0x637   :  { %45 = sbr.rel (!%p5000_p5) target bundleno = 51 (0x33), region = 153 }
 0x63e   :  { %2189 = vsyncpa [#allocation8], 1 }
 0x63f   :  { %2191 = vsyncpa [#allocation8 + $0x1], 1 }
 0x640   :  { %2192 = vsyncpa [#allocation11], 1 }
 0x641   :  { %2194 = vsyncpa [#allocation11 + $0x1], 1 }
 0x642   :  { %2195 = vsyncpa [#allocation14], 1 }
 0x643   :  { %2196 = vsyncpa [#allocation17], 1 }
 0x644   :  { %2197 = vsyncpa [#allocation9], 1 }
 0x645   :  { %2199 = vsyncpa [#allocation9 + $0x1], 1 }

</bundles_post_ra>
